<compile_context>
chip_gen: v7x
topology: tpu7x:2x2x1
jax: 0.10.0
libtpu: 0.0.40
codegen_flags: <defaults>
</compile_context>

<pallas_src>
import functools

import jax
import jax.numpy as jnp
from jax.experimental import pallas as pl
from jax.experimental.pallas import tpu as pltpu


def _round_up(x, m):
    return ((x + m - 1) // m) * m


def _interp_matrix(n_out, n_in):
    """1-D bilinear-resize matrix (align_corners=True), shape (n_out, n_in)."""
    if n_out == 1:
        src = jnp.zeros((1,), jnp.float32)
    else:
        src = jnp.arange(n_out, dtype=jnp.float32) * (n_in - 1) / (n_out - 1)
    lo = jnp.clip(jnp.floor(src), 0, n_in - 1).astype(jnp.int32)
    hi = jnp.minimum(lo + 1, n_in - 1)
    w_hi = src - lo.astype(jnp.float32)
    w_lo = 1.0 - w_hi
    rows = jnp.arange(n_out)
    a = jnp.zeros((n_out, n_in), jnp.float32)
    a = a.at[rows, lo].add(w_lo)
    a = a.at[rows, hi].add(w_hi)
    return a


def _eval_kernel(k_ref, disp_ref, gt_ref, ah_ref, awt_ref,
                 disp_out_ref, depth_out_ref, stats_ref,
                 *, tw, w_total, need_mask, strip_rows):
    wt = pl.program_id(0)
    b = pl.program_id(1)

    # --- bilinear upsample (align_corners=True) on the MXU; the *W scale is
    #     already folded into awt on the host ---
    d = disp_ref[...]                                                   # (h_in, w_in)
    tmp = jnp.dot(ah_ref[...], d, preferred_element_type=jnp.float32)   # (H, w_in)
    disp_up = jnp.dot(tmp, awt_ref[...],
                      preferred_element_type=jnp.float32)               # (H, tw)
    disp_out_ref[...] = disp_up

    kd = k_ref[b] * 0.54                                                # SMEM scalar

    # Remainder-tile lane mask from a (1, tw) iota (broadcast per strip below).
    if need_mask:
        col = wt * tw + jax.lax.broadcasted_iota(jnp.int32, (1, tw), 1)
        col_ok = col < w_total
    else:
        col_ok = None

    lane = jax.lax.broadcasted_iota(jnp.int32, (1, 128), 1)             # hoisted

    def strip_contrib(r0, nrows):
        # Read the upsampled disparity back from the VMEM-resident output tile.
        dsp = disp_out_ref[pl.ds(r0, nrows), :]
        gt = gt_ref[pl.ds(r0, nrows), :]

        # _disp2depth_kitti_K: depth = k*0.54 / (disp + (1 - (disp > 0)))
        denom = jnp.where(dsp > 0.0, dsp, dsp + 1.0)
        depth = kd * pl.reciprocal(denom)          # exact recip for stored plane
        depth = jnp.clip(depth, 0.001, 80.0)
        depth_out_ref[pl.ds(r0, nrows), :] = depth

        valid = jnp.logical_and(gt > 0.001, gt < 80.0)
        if col_ok is not None:
            valid = jnp.logical_and(valid, col_ok)

        gt_s = jnp.where(valid, gt, 1.0)
        # Metric-only reciprocals: approximate EUP vrcp (~1e-3 rel. error).
        inv_gt = pl.reciprocal(gt_s, approx=True)
        inv_depth = pl.reciprocal(depth, approx=True)

        diff = gt_s - depth
        ratio = gt_s * inv_depth
        thresh = jnp.maximum(ratio, depth * inv_gt)
        log_d = jnp.log(ratio)                     # == log(gt) - log(depth)

        def msum(x):
            # where(), not multiply-by-mask: padded lanes may hold NaN/Inf.
            return jnp.sum(jnp.where(valid, x, 0.0))

        vals = (jnp.sum(valid.astype(jnp.float32)),        # valid-pixel count
                msum(jnp.abs(diff) * inv_gt),              # abs_rel
                msum(diff * diff * inv_gt),                # sq_rel
                msum(diff * diff),                         # rms (pre-sqrt)
                msum(log_d * log_d),                       # log_rms (pre-sqrt)
                msum((thresh < 1.25).astype(jnp.float32)),
                msum((thresh < 1.25 ** 2).astype(jnp.float32)),
                msum((thresh < 1.25 ** 3).astype(jnp.float32)))

        contrib = jnp.zeros((1, 128), jnp.float32)
        for i, v in enumerate(vals):
            contrib = contrib + jnp.where(lane == i, v, 0.0)
        return contrib

    h_rows = gt_ref.shape[0]
    n_full = h_rows // strip_rows
    rem = h_rows - n_full * strip_rows

    acc = jnp.zeros((1, 128), jnp.float32)
    if n_full > 0:
        def body(s, a):
            r0 = pl.multiple_of(s * strip_rows, strip_rows)
            return a + strip_contrib(r0, strip_rows)
        acc = jax.lax.fori_loop(0, n_full, body, acc,
                                unroll=True if n_full <= 8 else 2)
    if rem:
        acc = acc + strip_contrib(n_full * strip_rows, rem)

    stats_ref[...] = acc


def _choose_tile_w(W, B, tile_w, H):
    if W <= tile_w:
        return W
    tw = _round_up(tile_w, 128)
    n_wt = -(-W // tw)
    # v7x has two TensorCores on the "parallel" grid axes; prefer an even
    # number of parallel steps so neither core idles (biggest lever at B == 1).
    if (n_wt * B) % 2 == 1:
        for target in (n_wt - 1, n_wt + 1):
            if target < 1 or (target * B) % 2 == 1:
                continue
            cand = _round_up(-(-W // target), 128)
            # keep per-step footprint modest: 3 f32 (H, cand) planes, x2 buffers
            if cand <= 1024 and 6 * H * cand * 4 <= (24 << 20):
                return cand
    return tw


def eval_monodepth_eigen(output_dict, target_dict, *, tile_w=512):
    disp = output_dict["disp_l1_pp"][0].astype(jnp.float32)        # (B,1,h_in,w_in)
    gt_depth = target_dict["target_depth"].astype(jnp.float32)     # (B,1,H,W)
    k_l1 = target_dict["input_k_l1"].astype(jnp.float32)           # (B,3,3)

    B, _, H, W = gt_depth.shape
    _, _, h_in, w_in = disp.shape

    tw = _choose_tile_w(W, B, tile_w, H)
    n_wt = -(-W // tw)                     # ceil div
    need_mask = (n_wt * tw != W)

    a_h = _interp_matrix(H, h_in)                               # (H, h_in)
    a_wt = _interp_matrix(W, w_in).T * jnp.float32(W)           # (w_in, W), *W folded in
    if need_mask:
        # pad the resize matrix so the last W-tile reads defined (zero) columns
        a_wt = jnp.pad(a_wt, ((0, 0), (0, n_wt * tw - W)))
    k_vals = k_l1[:, 0, 0]                                      # (B,)

    # Explicit VMEM budget (v5e default scoped limit is only 16 MiB).
    tile_b = H * tw * 4
    vmem_est = (2 * (3 * tile_b                 # gt + 2 output tiles (double-buffered)
                     + h_in * w_in * 4          # disp block
                     + H * h_in * 4             # A_h
                     + w_in * tw * 4            # A_w^T tile
                     + 128 * 4)                 # stats block
                + 2 * tile_b                    # in-kernel upsample temporaries
                + (2 << 20))                    # headroom
    vmem_limit = int(min(max(vmem_est, 16 << 20), 64 << 20))

    kern = functools.partial(_eval_kernel, tw=tw, w_total=W,
                             need_mask=need_mask, strip_rows=8)
    out_disp, out_depth, stats = pl.pallas_call(
        kern,
        # grid = (n_wt, B): the wide A_w^T tile is on the slow axis, so it stays
        # VMEM-resident across the whole batch; only the small disp block is
        # re-fetched per step.
        grid=(n_wt, B),
        in_specs=[
            pl.BlockSpec(memory_space=pltpu.MemorySpace.SMEM),                    # k_vals
            pl.BlockSpec((None, None, h_in, w_in), lambda wt, b: (b, 0, 0, 0)),   # disp
            pl.BlockSpec((None, None, H, tw), lambda wt, b: (b, 0, 0, wt)),       # gt tile
            pl.BlockSpec((H, h_in), lambda wt, b: (0, 0)),                        # A_h
            pl.BlockSpec((w_in, tw), lambda wt, b: (0, wt)),                      # A_w^T tile
        ],
        out_specs=[
            pl.BlockSpec((None, None, H, tw), lambda wt, b: (b, 0, 0, wt)),       # out_disp
            pl.BlockSpec((None, None, H, tw), lambda wt, b: (b, 0, 0, wt)),       # out_depth
            pl.BlockSpec((None, None, 1, 128), lambda wt, b: (b, wt, 0, 0)),      # stats
        ],
        out_shape=(
            jax.ShapeDtypeStruct((B, 1, H, W), jnp.float32),
            jax.ShapeDtypeStruct((B, 1, H, W), jnp.float32),
            jax.ShapeDtypeStruct((B, n_wt, 1, 128), jnp.float32),
        ),
        compiler_params=pltpu.CompilerParams(
            dimension_semantics=("parallel", "parallel"),
            vmem_limit_bytes=vmem_limit),
    )(k_vals, disp, gt_depth, a_h, a_wt)

    # TODO(synk): metrics are pixel-pooled over the whole batch (single divide),
    # matching boolean-mask indexing over the stacked tensor; if the reference
    # averages per-image metrics instead, divide per batch element first.
    total = jnp.sum(stats.reshape(-1, 128), axis=0)
    cnt = total[0]
    loss_dict = {
        "ab_r": total[1] / cnt,
        "sq_r": total[2] / cnt,
        "rms": jnp.sqrt(total[3] / cnt),
        "log_rms": jnp.sqrt(total[4] / cnt),
        "a1": total[5] / cnt,
        "a2": total[6] / cnt,
        "a3": total[7] / cnt,
    }
    new_output = dict(output_dict)
    new_output["out_disp_l_pp"] = out_disp
    new_output["out_depth_l_pp"] = out_depth
    return loss_dict, new_output


if __name__ == "__main__":
    key = jax.random.PRNGKey(0)
    B, h_in, w_in, H, W = 2, 8, 16, 16, 32
    k1, k2, k3 = jax.random.split(key, 3)

    # predicted disparity (before upsample), normalized units
    disp_pred = jax.random.uniform(k1, (B, 1, h_in, w_in), jnp.float32, 0.01, 0.9)
    # ground-truth depth with some invalid (zero) pixels
    gt = jax.random.uniform(k2, (B, 1, H, W), jnp.float32, 1.0, 70.0)
    holes = jax.random.bernoulli(k3, 0.2, (B, 1, H, W))
    gt = jnp.where(holes, 0.0, gt)
    # deterministic KITTI-like intrinsics
    K = jnp.tile(jnp.array([[[721.5, 0.0, 609.6],
                             [0.0, 721.5, 172.9],
                             [0.0, 0.0, 1.0]]], jnp.float32), (B, 1, 1))

    output_dict = {"disp_l1_pp": [disp_pred]}
    target_dict = {"target_depth": gt, "input_k_l1": K}

    loss_dict, out_dict = eval_monodepth_eigen(output_dict, target_dict)
    jax.block_until_ready(loss_dict)
    jax.block_until_ready(out_dict["out_depth_l_pp"])
    print("KERNEL_OK")
</pallas_src>

<mosaic_0001>
module attributes {stable_mosaic.version = 11 : i64} {
  func.func @_eval_kernel(%arg0: i32, %arg1: i32, %arg2: memref<2xf32, #tpu.memory_space<smem>>, %arg3: memref<1x1x8x16xf32, #tpu.memory_space<vmem>>, %arg4: memref<1x1x16x32xf32, #tpu.memory_space<vmem>>, %arg5: memref<16x8xf32, #tpu.memory_space<vmem>>, %arg6: memref<16x32xf32, #tpu.memory_space<vmem>>, %arg7: memref<1x1x16x32xf32, #tpu.memory_space<vmem>>, %arg8: memref<1x1x16x32xf32, #tpu.memory_space<vmem>>, %arg9: memref<1x1x1x128xf32, #tpu.memory_space<vmem>>) attributes {dimension_semantics = [#tpu.dimension_semantics<parallel>, #tpu.dimension_semantics<parallel>], iteration_bounds = array<i64: 1, 2>, scalar_prefetch = 0 : i64, scratch_operands = 0 : i64, tpu.core_type = #tpu.core_type<tc>, window_params = [{transform_indices = @transform_0, window_bounds = array<i64: 2>}, {transform_indices = @transform_1, window_bounds = array<i64: 1, 1, 8, 16>}, {transform_indices = @transform_2, window_bounds = array<i64: 1, 1, 16, 32>}, {pipeline_mode = #tpu.pipeline_mode<synchronous>, transform_indices = @transform_3, window_bounds = array<i64: 16, 8>}, {transform_indices = @transform_4, window_bounds = array<i64: 16, 32>}, {transform_indices = @transform_5, window_bounds = array<i64: 1, 1, 16, 32>}, {transform_indices = @transform_6, window_bounds = array<i64: 1, 1, 16, 32>}, {transform_indices = @transform_7, window_bounds = array<i64: 1, 1, 1, 128>}]} {
    %c0 = arith.constant 0 : index
    %c0_0 = arith.constant 0 : index
    %c0_1 = arith.constant 0 : index
    %c0_2 = arith.constant 0 : index
    %0 = vector.load %arg3[%c0, %c0_0, %c0_1, %c0_2] : memref<1x1x8x16xf32, #tpu.memory_space<vmem>>, vector<1x1x8x16xf32>
    %1 = vector.shape_cast %0 : vector<1x1x8x16xf32> to vector<8x16xf32>
    %c0_3 = arith.constant 0 : index
    %c0_4 = arith.constant 0 : index
    %2 = vector.load %arg5[%c0_3, %c0_4] : memref<16x8xf32, #tpu.memory_space<vmem>>, vector<16x8xf32>
    %cst = arith.constant dense<0.000000e+00> : vector<16x16xf32>
    %3 = tpu.matmul %2, %1, %cst {dimension_numbers = #tpu.dot_dimension_numbers<[1], [0], [0], [1], [0, 0, 1, 1], [], []>} : vector<16x8xf32>, vector<8x16xf32>, vector<16x16xf32> -> vector<16x16xf32>
    %c0_5 = arith.constant 0 : index
    %c0_6 = arith.constant 0 : index
    %4 = vector.load %arg6[%c0_5, %c0_6] : memref<16x32xf32, #tpu.memory_space<vmem>>, vector<16x32xf32>
    %cst_7 = arith.constant dense<0.000000e+00> : vector<16x32xf32>
    %5 = tpu.matmul %3, %4, %cst_7 {dimension_numbers = #tpu.dot_dimension_numbers<[1], [0], [0], [1], [0, 0, 1, 1], [], []>} : vector<16x16xf32>, vector<16x32xf32>, vector<16x32xf32> -> vector<16x32xf32>
    %c0_8 = arith.constant 0 : index
    %c0_9 = arith.constant 0 : index
    %c0_10 = arith.constant 0 : index
    %c0_11 = arith.constant 0 : index
    %6 = vector.load %arg7[%c0_8, %c0_9, %c0_10, %c0_11] : memref<1x1x16x32xf32, #tpu.memory_space<vmem>>, vector<1x1x16x32xf32>
    %7 = vector.shape_cast %6 : vector<1x1x16x32xf32> to vector<16x32xf32>
    %8 = vector.shape_cast %5 : vector<16x32xf32> to vector<1x1x16x32xf32>
    tpu.vector_store %arg7[%c0_8, %c0_9, %c0_10, %c0_11], %8 {strides = array<i32>} : memref<1x1x16x32xf32, #tpu.memory_space<vmem>>, vector<1x1x16x32xf32>,
    %9 = arith.index_cast %arg1 : i32 to index
    %10 = memref.load %arg2[%9] : memref<2xf32, #tpu.memory_space<smem>>
    %cst_12 = arith.constant 5.400000e-01 : f32
    %11 = arith.mulf %10, %cst_12 : f32
    %12 = tpu.iota {dimensions = array<i32: 1>} : vector<1x128xi32>
    %cst_13 = arith.constant 0.000000e+00 : f32
    %13 = vector.broadcast %cst_13 : f32 to vector<1x128xf32>
    %c0_i32 = arith.constant 0 : i32
    %c8_i32 = arith.constant 8 : i32
    %14 = arith.muli %c0_i32, %c8_i32 : i32
    %15 = tpu.assume_multiple %14, 8 : i32
    %c0_14 = arith.constant 0 : index
    %c0_15 = arith.constant 0 : index
    %16 = arith.index_cast %15 : i32 to index
    %c0_16 = arith.constant 0 : index
    %17 = vector.load %arg7[%c0_14, %c0_15, %16, %c0_16] : memref<1x1x16x32xf32, #tpu.memory_space<vmem>>, vector<1x1x8x32xf32>
    %18 = vector.shape_cast %17 : vector<1x1x8x32xf32> to vector<8x32xf32>
    %c0_17 = arith.constant 0 : index
    %c0_18 = arith.constant 0 : index
    %19 = arith.index_cast %15 : i32 to index
    %c0_19 = arith.constant 0 : index
    %20 = vector.load %arg4[%c0_17, %c0_18, %19, %c0_19] : memref<1x1x16x32xf32, #tpu.memory_space<vmem>>, vector<1x1x8x32xf32>
    %21 = vector.shape_cast %20 : vector<1x1x8x32xf32> to vector<8x32xf32>
    %cst_20 = arith.constant 0.000000e+00 : f32
    %22 = vector.broadcast %cst_20 : f32 to vector<8x32xf32>
    %23 = arith.cmpf ogt, %18, %22 : vector<8x32xf32>
    %cst_21 = arith.constant 1.000000e+00 : f32
    %24 = vector.broadcast %cst_21 : f32 to vector<8x32xf32>
    %25 = arith.addf %18, %24 : vector<8x32xf32>
    %26 = arith.select %23, %18, %25 : vector<8x32xi1>, vector<8x32xf32>
    %27 = tpu.reciprocal %26 : vector<8x32xf32> -> vector<8x32xf32>
    %28 = vector.broadcast %11 : f32 to vector<8x32xf32>
    %29 = arith.mulf %28, %27 : vector<8x32xf32>
    %cst_22 = arith.constant 1.000000e-03 : f32
    %cst_23 = arith.constant 8.000000e+01 : f32
    %30 = vector.broadcast %cst_22 : f32 to vector<8x32xf32>
    %31 = arith.maximumf %30, %29 : vector<8x32xf32>
    %32 = vector.broadcast %cst_23 : f32 to vector<8x32xf32>
    %33 = arith.minimumf %32, %31 : vector<8x32xf32>
    %c0_24 = arith.constant 0 : index
    %c0_25 = arith.constant 0 : index
    %34 = arith.index_cast %15 : i32 to index
    %c0_26 = arith.constant 0 : index
    %35 = vector.load %arg8[%c0_24, %c0_25, %34, %c0_26] : memref<1x1x16x32xf32, #tpu.memory_space<vmem>>, vector<1x1x8x32xf32>
    %36 = vector.shape_cast %35 : vector<1x1x8x32xf32> to vector<8x32xf32>
    %37 = vector.shape_cast %33 : vector<8x32xf32> to vector<1x1x8x32xf32>
    tpu.vector_store %arg8[%c0_24, %c0_25, %34, %c0_26], %37 {strides = array<i32>} : memref<1x1x16x32xf32, #tpu.memory_space<vmem>>, vector<1x1x8x32xf32>,
    %cst_27 = arith.constant 1.000000e-03 : f32
    %38 = vector.broadcast %cst_27 : f32 to vector<8x32xf32>
    %39 = arith.cmpf ogt, %21, %38 : vector<8x32xf32>
    %cst_28 = arith.constant 8.000000e+01 : f32
    %40 = vector.broadcast %cst_28 : f32 to vector<8x32xf32>
    %41 = arith.cmpf olt, %21, %40 : vector<8x32xf32>
    %42 = arith.andi %39, %41 : vector<8x32xi1>
    %cst_29 = arith.constant 1.000000e+00 : f32
    %43 = vector.broadcast %cst_29 : f32 to vector<8x32xf32>
    %44 = arith.select %42, %21, %43 : vector<8x32xi1>, vector<8x32xf32>
    %45 = tpu.reciprocal %44 {approx = true} : vector<8x32xf32> -> vector<8x32xf32>
    %46 = tpu.reciprocal %33 {approx = true} : vector<8x32xf32> -> vector<8x32xf32>
    %47 = arith.subf %44, %33 : vector<8x32xf32>
    %48 = arith.mulf %44, %46 : vector<8x32xf32>
    %49 = arith.mulf %33, %45 : vector<8x32xf32>
    %50 = arith.maximumf %48, %49 : vector<8x32xf32>
    %51 = math.log %48 : vector<8x32xf32>
    %52 = arith.extui %42 : vector<8x32xi1> to vector<8x32xi32>
    %53 = arith.sitofp %52 : vector<8x32xi32> to vector<8x32xf32>
    %54 = vector.shape_cast %53 : vector<8x32xf32> to vector<1x8x32xf32>
    %cst_30 = arith.constant dense<0.000000e+00> : vector<1xf32>
    %55 = vector.multi_reduction <add>, %54, %cst_30 [1, 2] : vector<1x8x32xf32> to vector<1xf32>
    %56 = vector.shape_cast %55 : vector<1xf32> to vector<1x1x1xf32>
    %57 = vector.extract %56[0, 0, 0] : f32 from vector<1x1x1xf32>
    %58 = math.absf %47 : vector<8x32xf32>
    %59 = arith.mulf %58, %45 : vector<8x32xf32>
    %cst_31 = arith.constant 0.000000e+00 : f32
    %60 = vector.broadcast %cst_31 : f32 to vector<8x32xf32>
    %61 = arith.select %42, %59, %60 : vector<8x32xi1>, vector<8x32xf32>
    %62 = vector.shape_cast %61 : vector<8x32xf32> to vector<1x8x32xf32>
    %cst_32 = arith.constant dense<0.000000e+00> : vector<1xf32>
    %63 = vector.multi_reduction <add>, %62, %cst_32 [1, 2] : vector<1x8x32xf32> to vector<1xf32>
    %64 = vector.shape_cast %63 : vector<1xf32> to vector<1x1x1xf32>
    %65 = vector.extract %64[0, 0, 0] : f32 from vector<1x1x1xf32>
    %66 = arith.mulf %47, %47 : vector<8x32xf32>
    %67 = arith.mulf %66, %45 : vector<8x32xf32>
    %cst_33 = arith.constant 0.000000e+00 : f32
    %68 = vector.broadcast %cst_33 : f32 to vector<8x32xf32>
    %69 = arith.select %42, %67, %68 : vector<8x32xi1>, vector<8x32xf32>
    %70 = vector.shape_cast %69 : vector<8x32xf32> to vector<1x8x32xf32>
    %cst_34 = arith.constant dense<0.000000e+00> : vector<1xf32>
    %71 = vector.multi_reduction <add>, %70, %cst_34 [1, 2] : vector<1x8x32xf32> to vector<1xf32>
    %72 = vector.shape_cast %71 : vector<1xf32> to vector<1x1x1xf32>
    %73 = vector.extract %72[0, 0, 0] : f32 from vector<1x1x1xf32>
    %74 = arith.mulf %47, %47 : vector<8x32xf32>
    %cst_35 = arith.constant 0.000000e+00 : f32
    %75 = vector.broadcast %cst_35 : f32 to vector<8x32xf32>
    %76 = arith.select %42, %74, %75 : vector<8x32xi1>, vector<8x32xf32>
    %77 = vector.shape_cast %76 : vector<8x32xf32> to vector<1x8x32xf32>
    %cst_36 = arith.constant dense<0.000000e+00> : vector<1xf32>
    %78 = vector.multi_reduction <add>, %77, %cst_36 [1, 2] : vector<1x8x32xf32> to vector<1xf32>
    %79 = vector.shape_cast %78 : vector<1xf32> to vector<1x1x1xf32>
    %80 = vector.extract %79[0, 0, 0] : f32 from vector<1x1x1xf32>
    %81 = arith.mulf %51, %51 : vector<8x32xf32>
    %cst_37 = arith.constant 0.000000e+00 : f32
    %82 = vector.broadcast %cst_37 : f32 to vector<8x32xf32>
    %83 = arith.select %42, %81, %82 : vector<8x32xi1>, vector<8x32xf32>
    %84 = vector.shape_cast %83 : vector<8x32xf32> to vector<1x8x32xf32>
    %cst_38 = arith.constant dense<0.000000e+00> : vector<1xf32>
    %85 = vector.multi_reduction <add>, %84, %cst_38 [1, 2] : vector<1x8x32xf32> to vector<1xf32>
    %86 = vector.shape_cast %85 : vector<1xf32> to vector<1x1x1xf32>
    %87 = vector.extract %86[0, 0, 0] : f32 from vector<1x1x1xf32>
    %cst_39 = arith.constant 1.250000e+00 : f32
    %88 = vector.broadcast %cst_39 : f32 to vector<8x32xf32>
    %89 = arith.cmpf olt, %50, %88 : vector<8x32xf32>
    %90 = arith.extui %89 : vector<8x32xi1> to vector<8x32xi32>
    %91 = arith.sitofp %90 : vector<8x32xi32> to vector<8x32xf32>
    %cst_40 = arith.constant 0.000000e+00 : f32
    %92 = vector.broadcast %cst_40 : f32 to vector<8x32xf32>
    %93 = arith.select %42, %91, %92 : vector<8x32xi1>, vector<8x32xf32>
    %94 = vector.shape_cast %93 : vector<8x32xf32> to vector<1x8x32xf32>
    %cst_41 = arith.constant dense<0.000000e+00> : vector<1xf32>
    %95 = vector.multi_reduction <add>, %94, %cst_41 [1, 2] : vector<1x8x32xf32> to vector<1xf32>
    %96 = vector.shape_cast %95 : vector<1xf32> to vector<1x1x1xf32>
    %97 = vector.extract %96[0, 0, 0] : f32 from vector<1x1x1xf32>
    %cst_42 = arith.constant 1.562500e+00 : f32
    %98 = vector.broadcast %cst_42 : f32 to vector<8x32xf32>
    %99 = arith.cmpf olt, %50, %98 : vector<8x32xf32>
    %100 = arith.extui %99 : vector<8x32xi1> to vector<8x32xi32>
    %101 = arith.sitofp %100 : vector<8x32xi32> to vector<8x32xf32>
    %cst_43 = arith.constant 0.000000e+00 : f32
    %102 = vector.broadcast %cst_43 : f32 to vector<8x32xf32>
    %103 = arith.select %42, %101, %102 : vector<8x32xi1>, vector<8x32xf32>
    %104 = vector.shape_cast %103 : vector<8x32xf32> to vector<1x8x32xf32>
    %cst_44 = arith.constant dense<0.000000e+00> : vector<1xf32>
    %105 = vector.multi_reduction <add>, %104, %cst_44 [1, 2] : vector<1x8x32xf32> to vector<1xf32>
    %106 = vector.shape_cast %105 : vector<1xf32> to vector<1x1x1xf32>
    %107 = vector.extract %106[0, 0, 0] : f32 from vector<1x1x1xf32>
    %cst_45 = arith.constant 1.953125 : f32
    %108 = vector.broadcast %cst_45 : f32 to vector<8x32xf32>
    %109 = arith.cmpf olt, %50, %108 : vector<8x32xf32>
    %110 = arith.extui %109 : vector<8x32xi1> to vector<8x32xi32>
    %111 = arith.sitofp %110 : vector<8x32xi32> to vector<8x32xf32>
    %cst_46 = arith.constant 0.000000e+00 : f32
    %112 = vector.broadcast %cst_46 : f32 to vector<8x32xf32>
    %113 = arith.select %42, %111, %112 : vector<8x32xi1>, vector<8x32xf32>
    %114 = vector.shape_cast %113 : vector<8x32xf32> to vector<1x8x32xf32>
    %cst_47 = arith.constant dense<0.000000e+00> : vector<1xf32>
    %115 = vector.multi_reduction <add>, %114, %cst_47 [1, 2] : vector<1x8x32xf32> to vector<1xf32>
    %116 = vector.shape_cast %115 : vector<1xf32> to vector<1x1x1xf32>
    %117 = vector.extract %116[0, 0, 0] : f32 from vector<1x1x1xf32>
    %cst_48 = arith.constant 0.000000e+00 : f32
    %118 = vector.broadcast %cst_48 : f32 to vector<1x128xf32>
    %c0_i32_49 = arith.constant 0 : i32
    %119 = vector.broadcast %c0_i32_49 : i32 to vector<1x128xi32>
    %120 = arith.cmpi eq, %12, %119 : vector<1x128xi32>
    %cst_50 = arith.constant 0.000000e+00 : f32
    %121 = vector.broadcast %57 : f32 to vector<1x128xf32>
    %122 = vector.broadcast %cst_50 : f32 to vector<1x128xf32>
    %123 = arith.select %120, %121, %122 : vector<1x128xi1>, vector<1x128xf32>
    %124 = arith.addf %118, %123 : vector<1x128xf32>
    %c1_i32 = arith.constant 1 : i32
    %125 = vector.broadcast %c1_i32 : i32 to vector<1x128xi32>
    %126 = arith.cmpi eq, %12, %125 : vector<1x128xi32>
    %cst_51 = arith.constant 0.000000e+00 : f32
    %127 = vector.broadcast %65 : f32 to vector<1x128xf32>
    %128 = vector.broadcast %cst_51 : f32 to vector<1x128xf32>
    %129 = arith.select %126, %127, %128 : vector<1x128xi1>, vector<1x128xf32>
    %130 = arith.addf %124, %129 : vector<1x128xf32>
    %c2_i32 = arith.constant 2 : i32
    %131 = vector.broadcast %c2_i32 : i32 to vector<1x128xi32>
    %132 = arith.cmpi eq, %12, %131 : vector<1x128xi32>
    %cst_52 = arith.constant 0.000000e+00 : f32
    %133 = vector.broadcast %73 : f32 to vector<1x128xf32>
    %134 = vector.broadcast %cst_52 : f32 to vector<1x128xf32>
    %135 = arith.select %132, %133, %134 : vector<1x128xi1>, vector<1x128xf32>
    %136 = arith.addf %130, %135 : vector<1x128xf32>
    %c3_i32 = arith.constant 3 : i32
    %137 = vector.broadcast %c3_i32 : i32 to vector<1x128xi32>
    %138 = arith.cmpi eq, %12, %137 : vector<1x128xi32>
    %cst_53 = arith.constant 0.000000e+00 : f32
    %139 = vector.broadcast %80 : f32 to vector<1x128xf32>
    %140 = vector.broadcast %cst_53 : f32 to vector<1x128xf32>
    %141 = arith.select %138, %139, %140 : vector<1x128xi1>, vector<1x128xf32>
    %142 = arith.addf %136, %141 : vector<1x128xf32>
    %c4_i32 = arith.constant 4 : i32
    %143 = vector.broadcast %c4_i32 : i32 to vector<1x128xi32>
    %144 = arith.cmpi eq, %12, %143 : vector<1x128xi32>
    %cst_54 = arith.constant 0.000000e+00 : f32
    %145 = vector.broadcast %87 : f32 to vector<1x128xf32>
    %146 = vector.broadcast %cst_54 : f32 to vector<1x128xf32>
    %147 = arith.select %144, %145, %146 : vector<1x128xi1>, vector<1x128xf32>
    %148 = arith.addf %142, %147 : vector<1x128xf32>
    %c5_i32 = arith.constant 5 : i32
    %149 = vector.broadcast %c5_i32 : i32 to vector<1x128xi32>
    %150 = arith.cmpi eq, %12, %149 : vector<1x128xi32>
    %cst_55 = arith.constant 0.000000e+00 : f32
    %151 = vector.broadcast %97 : f32 to vector<1x128xf32>
    %152 = vector.broadcast %cst_55 : f32 to vector<1x128xf32>
    %153 = arith.select %150, %151, %152 : vector<1x128xi1>, vector<1x128xf32>
    %154 = arith.addf %148, %153 : vector<1x128xf32>
    %c6_i32 = arith.constant 6 : i32
    %155 = vector.broadcast %c6_i32 : i32 to vector<1x128xi32>
    %156 = arith.cmpi eq, %12, %155 : vector<1x128xi32>
    %cst_56 = arith.constant 0.000000e+00 : f32
    %157 = vector.broadcast %107 : f32 to vector<1x128xf32>
    %158 = vector.broadcast %cst_56 : f32 to vector<1x128xf32>
    %159 = arith.select %156, %157, %158 : vector<1x128xi1>, vector<1x128xf32>
    %160 = arith.addf %154, %159 : vector<1x128xf32>
    %c7_i32 = arith.constant 7 : i32
    %161 = vector.broadcast %c7_i32 : i32 to vector<1x128xi32>
    %162 = arith.cmpi eq, %12, %161 : vector<1x128xi32>
    %cst_57 = arith.constant 0.000000e+00 : f32
    %163 = vector.broadcast %117 : f32 to vector<1x128xf32>
    %164 = vector.broadcast %cst_57 : f32 to vector<1x128xf32>
    %165 = arith.select %162, %163, %164 : vector<1x128xi1>, vector<1x128xf32>
    %166 = arith.addf %160, %165 : vector<1x128xf32>
    %167 = arith.addf %13, %166 : vector<1x128xf32>
    %c1_i32_58 = arith.constant 1 : i32
    %c8_i32_59 = arith.constant 8 : i32
    %168 = arith.muli %c1_i32_58, %c8_i32_59 : i32
    %169 = tpu.assume_multiple %168, 8 : i32
    %c0_60 = arith.constant 0 : index
    %c0_61 = arith.constant 0 : index
    %170 = arith.index_cast %169 : i32 to index
    %c0_62 = arith.constant 0 : index
    %171 = vector.load %arg7[%c0_60, %c0_61, %170, %c0_62] : memref<1x1x16x32xf32, #tpu.memory_space<vmem>>, vector<1x1x8x32xf32>
    %172 = vector.shape_cast %171 : vector<1x1x8x32xf32> to vector<8x32xf32>
    %c0_63 = arith.constant 0 : index
    %c0_64 = arith.constant 0 : index
    %173 = arith.index_cast %169 : i32 to index
    %c0_65 = arith.constant 0 : index
    %174 = vector.load %arg4[%c0_63, %c0_64, %173, %c0_65] : memref<1x1x16x32xf32, #tpu.memory_space<vmem>>, vector<1x1x8x32xf32>
    %175 = vector.shape_cast %174 : vector<1x1x8x32xf32> to vector<8x32xf32>
    %cst_66 = arith.constant 0.000000e+00 : f32
    %176 = vector.broadcast %cst_66 : f32 to vector<8x32xf32>
    %177 = arith.cmpf ogt, %172, %176 : vector<8x32xf32>
    %cst_67 = arith.constant 1.000000e+00 : f32
    %178 = vector.broadcast %cst_67 : f32 to vector<8x32xf32>
    %179 = arith.addf %172, %178 : vector<8x32xf32>
    %180 = arith.select %177, %172, %179 : vector<8x32xi1>, vector<8x32xf32>
    %181 = tpu.reciprocal %180 : vector<8x32xf32> -> vector<8x32xf32>
    %182 = vector.broadcast %11 : f32 to vector<8x32xf32>
    %183 = arith.mulf %182, %181 : vector<8x32xf32>
    %cst_68 = arith.constant 1.000000e-03 : f32
    %cst_69 = arith.constant 8.000000e+01 : f32
    %184 = vector.broadcast %cst_68 : f32 to vector<8x32xf32>
    %185 = arith.maximumf %184, %183 : vector<8x32xf32>
    %186 = vector.broadcast %cst_69 : f32 to vector<8x32xf32>
    %187 = arith.minimumf %186, %185 : vector<8x32xf32>
    %c0_70 = arith.constant 0 : index
    %c0_71 = arith.constant 0 : index
    %188 = arith.index_cast %169 : i32 to index
    %c0_72 = arith.constant 0 : index
    %189 = vector.load %arg8[%c0_70, %c0_71, %188, %c0_72] : memref<1x1x16x32xf32, #tpu.memory_space<vmem>>, vector<1x1x8x32xf32>
    %190 = vector.shape_cast %189 : vector<1x1x8x32xf32> to vector<8x32xf32>
    %191 = vector.shape_cast %187 : vector<8x32xf32> to vector<1x1x8x32xf32>
    tpu.vector_store %arg8[%c0_70, %c0_71, %188, %c0_72], %191 {strides = array<i32>} : memref<1x1x16x32xf32, #tpu.memory_space<vmem>>, vector<1x1x8x32xf32>,
    %cst_73 = arith.constant 1.000000e-03 : f32
    %192 = vector.broadcast %cst_73 : f32 to vector<8x32xf32>
    %193 = arith.cmpf ogt, %175, %192 : vector<8x32xf32>
    %cst_74 = arith.constant 8.000000e+01 : f32
    %194 = vector.broadcast %cst_74 : f32 to vector<8x32xf32>
    %195 = arith.cmpf olt, %175, %194 : vector<8x32xf32>
    %196 = arith.andi %193, %195 : vector<8x32xi1>
    %cst_75 = arith.constant 1.000000e+00 : f32
    %197 = vector.broadcast %cst_75 : f32 to vector<8x32xf32>
    %198 = arith.select %196, %175, %197 : vector<8x32xi1>, vector<8x32xf32>
    %199 = tpu.reciprocal %198 {approx = true} : vector<8x32xf32> -> vector<8x32xf32>
    %200 = tpu.reciprocal %187 {approx = true} : vector<8x32xf32> -> vector<8x32xf32>
    %201 = arith.subf %198, %187 : vector<8x32xf32>
    %202 = arith.mulf %198, %200 : vector<8x32xf32>
    %203 = arith.mulf %187, %199 : vector<8x32xf32>
    %204 = arith.maximumf %202, %203 : vector<8x32xf32>
    %205 = math.log %202 : vector<8x32xf32>
    %206 = arith.extui %196 : vector<8x32xi1> to vector<8x32xi32>
    %207 = arith.sitofp %206 : vector<8x32xi32> to vector<8x32xf32>
    %208 = vector.shape_cast %207 : vector<8x32xf32> to vector<1x8x32xf32>
    %cst_76 = arith.constant dense<0.000000e+00> : vector<1xf32>
    %209 = vector.multi_reduction <add>, %208, %cst_76 [1, 2] : vector<1x8x32xf32> to vector<1xf32>
    %210 = vector.shape_cast %209 : vector<1xf32> to vector<1x1x1xf32>
    %211 = vector.extract %210[0, 0, 0] : f32 from vector<1x1x1xf32>
    %212 = math.absf %201 : vector<8x32xf32>
    %213 = arith.mulf %212, %199 : vector<8x32xf32>
    %cst_77 = arith.constant 0.000000e+00 : f32
    %214 = vector.broadcast %cst_77 : f32 to vector<8x32xf32>
    %215 = arith.select %196, %213, %214 : vector<8x32xi1>, vector<8x32xf32>
    %216 = vector.shape_cast %215 : vector<8x32xf32> to vector<1x8x32xf32>
    %cst_78 = arith.constant dense<0.000000e+00> : vector<1xf32>
    %217 = vector.multi_reduction <add>, %216, %cst_78 [1, 2] : vector<1x8x32xf32> to vector<1xf32>
    %218 = vector.shape_cast %217 : vector<1xf32> to vector<1x1x1xf32>
    %219 = vector.extract %218[0, 0, 0] : f32 from vector<1x1x1xf32>
    %220 = arith.mulf %201, %201 : vector<8x32xf32>
    %221 = arith.mulf %220, %199 : vector<8x32xf32>
    %cst_79 = arith.constant 0.000000e+00 : f32
    %222 = vector.broadcast %cst_79 : f32 to vector<8x32xf32>
    %223 = arith.select %196, %221, %222 : vector<8x32xi1>, vector<8x32xf32>
    %224 = vector.shape_cast %223 : vector<8x32xf32> to vector<1x8x32xf32>
    %cst_80 = arith.constant dense<0.000000e+00> : vector<1xf32>
    %225 = vector.multi_reduction <add>, %224, %cst_80 [1, 2] : vector<1x8x32xf32> to vector<1xf32>
    %226 = vector.shape_cast %225 : vector<1xf32> to vector<1x1x1xf32>
    %227 = vector.extract %226[0, 0, 0] : f32 from vector<1x1x1xf32>
    %228 = arith.mulf %201, %201 : vector<8x32xf32>
    %cst_81 = arith.constant 0.000000e+00 : f32
    %229 = vector.broadcast %cst_81 : f32 to vector<8x32xf32>
    %230 = arith.select %196, %228, %229 : vector<8x32xi1>, vector<8x32xf32>
    %231 = vector.shape_cast %230 : vector<8x32xf32> to vector<1x8x32xf32>
    %cst_82 = arith.constant dense<0.000000e+00> : vector<1xf32>
    %232 = vector.multi_reduction <add>, %231, %cst_82 [1, 2] : vector<1x8x32xf32> to vector<1xf32>
    %233 = vector.shape_cast %232 : vector<1xf32> to vector<1x1x1xf32>
    %234 = vector.extract %233[0, 0, 0] : f32 from vector<1x1x1xf32>
    %235 = arith.mulf %205, %205 : vector<8x32xf32>
    %cst_83 = arith.constant 0.000000e+00 : f32
    %236 = vector.broadcast %cst_83 : f32 to vector<8x32xf32>
    %237 = arith.select %196, %235, %236 : vector<8x32xi1>, vector<8x32xf32>
    %238 = vector.shape_cast %237 : vector<8x32xf32> to vector<1x8x32xf32>
    %cst_84 = arith.constant dense<0.000000e+00> : vector<1xf32>
    %239 = vector.multi_reduction <add>, %238, %cst_84 [1, 2] : vector<1x8x32xf32> to vector<1xf32>
    %240 = vector.shape_cast %239 : vector<1xf32> to vector<1x1x1xf32>
    %241 = vector.extract %240[0, 0, 0] : f32 from vector<1x1x1xf32>
    %cst_85 = arith.constant 1.250000e+00 : f32
    %242 = vector.broadcast %cst_85 : f32 to vector<8x32xf32>
    %243 = arith.cmpf olt, %204, %242 : vector<8x32xf32>
    %244 = arith.extui %243 : vector<8x32xi1> to vector<8x32xi32>
    %245 = arith.sitofp %244 : vector<8x32xi32> to vector<8x32xf32>
    %cst_86 = arith.constant 0.000000e+00 : f32
    %246 = vector.broadcast %cst_86 : f32 to vector<8x32xf32>
    %247 = arith.select %196, %245, %246 : vector<8x32xi1>, vector<8x32xf32>
    %248 = vector.shape_cast %247 : vector<8x32xf32> to vector<1x8x32xf32>
    %cst_87 = arith.constant dense<0.000000e+00> : vector<1xf32>
    %249 = vector.multi_reduction <add>, %248, %cst_87 [1, 2] : vector<1x8x32xf32> to vector<1xf32>
    %250 = vector.shape_cast %249 : vector<1xf32> to vector<1x1x1xf32>
    %251 = vector.extract %250[0, 0, 0] : f32 from vector<1x1x1xf32>
    %cst_88 = arith.constant 1.562500e+00 : f32
    %252 = vector.broadcast %cst_88 : f32 to vector<8x32xf32>
    %253 = arith.cmpf olt, %204, %252 : vector<8x32xf32>
    %254 = arith.extui %253 : vector<8x32xi1> to vector<8x32xi32>
    %255 = arith.sitofp %254 : vector<8x32xi32> to vector<8x32xf32>
    %cst_89 = arith.constant 0.000000e+00 : f32
    %256 = vector.broadcast %cst_89 : f32 to vector<8x32xf32>
    %257 = arith.select %196, %255, %256 : vector<8x32xi1>, vector<8x32xf32>
    %258 = vector.shape_cast %257 : vector<8x32xf32> to vector<1x8x32xf32>
    %cst_90 = arith.constant dense<0.000000e+00> : vector<1xf32>
    %259 = vector.multi_reduction <add>, %258, %cst_90 [1, 2] : vector<1x8x32xf32> to vector<1xf32>
    %260 = vector.shape_cast %259 : vector<1xf32> to vector<1x1x1xf32>
    %261 = vector.extract %260[0, 0, 0] : f32 from vector<1x1x1xf32>
    %cst_91 = arith.constant 1.953125 : f32
    %262 = vector.broadcast %cst_91 : f32 to vector<8x32xf32>
    %263 = arith.cmpf olt, %204, %262 : vector<8x32xf32>
    %264 = arith.extui %263 : vector<8x32xi1> to vector<8x32xi32>
    %265 = arith.sitofp %264 : vector<8x32xi32> to vector<8x32xf32>
    %cst_92 = arith.constant 0.000000e+00 : f32
    %266 = vector.broadcast %cst_92 : f32 to vector<8x32xf32>
    %267 = arith.select %196, %265, %266 : vector<8x32xi1>, vector<8x32xf32>
    %268 = vector.shape_cast %267 : vector<8x32xf32> to vector<1x8x32xf32>
    %cst_93 = arith.constant dense<0.000000e+00> : vector<1xf32>
    %269 = vector.multi_reduction <add>, %268, %cst_93 [1, 2] : vector<1x8x32xf32> to vector<1xf32>
    %270 = vector.shape_cast %269 : vector<1xf32> to vector<1x1x1xf32>
    %271 = vector.extract %270[0, 0, 0] : f32 from vector<1x1x1xf32>
    %cst_94 = arith.constant 0.000000e+00 : f32
    %272 = vector.broadcast %cst_94 : f32 to vector<1x128xf32>
    %c0_i32_95 = arith.constant 0 : i32
    %273 = vector.broadcast %c0_i32_95 : i32 to vector<1x128xi32>
    %274 = arith.cmpi eq, %12, %273 : vector<1x128xi32>
    %cst_96 = arith.constant 0.000000e+00 : f32
    %275 = vector.broadcast %211 : f32 to vector<1x128xf32>
    %276 = vector.broadcast %cst_96 : f32 to vector<1x128xf32>
    %277 = arith.select %274, %275, %276 : vector<1x128xi1>, vector<1x128xf32>
    %278 = arith.addf %272, %277 : vector<1x128xf32>
    %c1_i32_97 = arith.constant 1 : i32
    %279 = vector.broadcast %c1_i32_97 : i32 to vector<1x128xi32>
    %280 = arith.cmpi eq, %12, %279 : vector<1x128xi32>
    %cst_98 = arith.constant 0.000000e+00 : f32
    %281 = vector.broadcast %219 : f32 to vector<1x128xf32>
    %282 = vector.broadcast %cst_98 : f32 to vector<1x128xf32>
    %283 = arith.select %280, %281, %282 : vector<1x128xi1>, vector<1x128xf32>
    %284 = arith.addf %278, %283 : vector<1x128xf32>
    %c2_i32_99 = arith.constant 2 : i32
    %285 = vector.broadcast %c2_i32_99 : i32 to vector<1x128xi32>
    %286 = arith.cmpi eq, %12, %285 : vector<1x128xi32>
    %cst_100 = arith.constant 0.000000e+00 : f32
    %287 = vector.broadcast %227 : f32 to vector<1x128xf32>
    %288 = vector.broadcast %cst_100 : f32 to vector<1x128xf32>
    %289 = arith.select %286, %287, %288 : vector<1x128xi1>, vector<1x128xf32>
    %290 = arith.addf %284, %289 : vector<1x128xf32>
    %c3_i32_101 = arith.constant 3 : i32
    %291 = vector.broadcast %c3_i32_101 : i32 to vector<1x128xi32>
    %292 = arith.cmpi eq, %12, %291 : vector<1x128xi32>
    %cst_102 = arith.constant 0.000000e+00 : f32
    %293 = vector.broadcast %234 : f32 to vector<1x128xf32>
    %294 = vector.broadcast %cst_102 : f32 to vector<1x128xf32>
    %295 = arith.select %292, %293, %294 : vector<1x128xi1>, vector<1x128xf32>
    %296 = arith.addf %290, %295 : vector<1x128xf32>
    %c4_i32_103 = arith.constant 4 : i32
    %297 = vector.broadcast %c4_i32_103 : i32 to vector<1x128xi32>
    %298 = arith.cmpi eq, %12, %297 : vector<1x128xi32>
    %cst_104 = arith.constant 0.000000e+00 : f32
    %299 = vector.broadcast %241 : f32 to vector<1x128xf32>
    %300 = vector.broadcast %cst_104 : f32 to vector<1x128xf32>
    %301 = arith.select %298, %299, %300 : vector<1x128xi1>, vector<1x128xf32>
    %302 = arith.addf %296, %301 : vector<1x128xf32>
    %c5_i32_105 = arith.constant 5 : i32
    %303 = vector.broadcast %c5_i32_105 : i32 to vector<1x128xi32>
    %304 = arith.cmpi eq, %12, %303 : vector<1x128xi32>
    %cst_106 = arith.constant 0.000000e+00 : f32
    %305 = vector.broadcast %251 : f32 to vector<1x128xf32>
    %306 = vector.broadcast %cst_106 : f32 to vector<1x128xf32>
    %307 = arith.select %304, %305, %306 : vector<1x128xi1>, vector<1x128xf32>
    %308 = arith.addf %302, %307 : vector<1x128xf32>
    %c6_i32_107 = arith.constant 6 : i32
    %309 = vector.broadcast %c6_i32_107 : i32 to vector<1x128xi32>
    %310 = arith.cmpi eq, %12, %309 : vector<1x128xi32>
    %cst_108 = arith.constant 0.000000e+00 : f32
    %311 = vector.broadcast %261 : f32 to vector<1x128xf32>
    %312 = vector.broadcast %cst_108 : f32 to vector<1x128xf32>
    %313 = arith.select %310, %311, %312 : vector<1x128xi1>, vector<1x128xf32>
    %314 = arith.addf %308, %313 : vector<1x128xf32>
    %c7_i32_109 = arith.constant 7 : i32
    %315 = vector.broadcast %c7_i32_109 : i32 to vector<1x128xi32>
    %316 = arith.cmpi eq, %12, %315 : vector<1x128xi32>
    %cst_110 = arith.constant 0.000000e+00 : f32
    %317 = vector.broadcast %271 : f32 to vector<1x128xf32>
    %318 = vector.broadcast %cst_110 : f32 to vector<1x128xf32>
    %319 = arith.select %316, %317, %318 : vector<1x128xi1>, vector<1x128xf32>
    %320 = arith.addf %314, %319 : vector<1x128xf32>
    %321 = arith.addf %167, %320 : vector<1x128xf32>
    %c2_i32_111 = arith.constant 2 : i32
    %c0_112 = arith.constant 0 : index
    %c0_113 = arith.constant 0 : index
    %c0_114 = arith.constant 0 : index
    %c0_115 = arith.constant 0 : index
    %322 = vector.load %arg9[%c0_112, %c0_113, %c0_114, %c0_115] : memref<1x1x1x128xf32, #tpu.memory_space<vmem>>, vector<1x1x1x128xf32>
    %323 = vector.shape_cast %322 : vector<1x1x1x128xf32> to vector<1x128xf32>
    %324 = vector.shape_cast %321 : vector<1x128xf32> to vector<1x1x1x128xf32>
    tpu.vector_store %arg9[%c0_112, %c0_113, %c0_114, %c0_115], %324 {strides = array<i32>} : memref<1x1x1x128xf32, #tpu.memory_space<vmem>>, vector<1x1x1x128xf32>,
    return
  }
  func.func @transform_0(%arg0: i32, %arg1: i32) -> i32 {
    %c0_i32 = arith.constant 0 : i32
    %c0_i32_0 = arith.constant 0 : i32
    return %c0_i32 : i32
  }
  func.func @transform_1(%arg0: i32, %arg1: i32) -> (i32, i32, i32, i32) {
    %c0_i32 = arith.constant 0 : i32
    %c0_i32_0 = arith.constant 0 : i32
    %c0_i32_1 = arith.constant 0 : i32
    %c0_i32_2 = arith.constant 0 : i32
    return %arg1, %c0_i32, %c0_i32_0, %c0_i32_1 : i32, i32, i32, i32
  }
  func.func @transform_2(%arg0: i32, %arg1: i32) -> (i32, i32, i32, i32) {
    %c0_i32 = arith.constant 0 : i32
    %c0_i32_0 = arith.constant 0 : i32
    %c0_i32_1 = arith.constant 0 : i32
    return %arg1, %c0_i32, %c0_i32_0, %arg0 : i32, i32, i32, i32
  }
  func.func @transform_3(%arg0: i32, %arg1: i32) -> (i32, i32) {
    %c0_i32 = arith.constant 0 : i32
    %c0_i32_0 = arith.constant 0 : i32
    %c0_i32_1 = arith.constant 0 : i32
    return %c0_i32, %c0_i32_0 : i32, i32
  }
  func.func @transform_4(%arg0: i32, %arg1: i32) -> (i32, i32) {
    %c0_i32 = arith.constant 0 : i32
    %c0_i32_0 = arith.constant 0 : i32
    return %c0_i32, %arg0 : i32, i32
  }
  func.func @transform_5(%arg0: i32, %arg1: i32) -> (i32, i32, i32, i32) {
    %c0_i32 = arith.constant 0 : i32
    %c0_i32_0 = arith.constant 0 : i32
    %c0_i32_1 = arith.constant 0 : i32
    return %arg1, %c0_i32, %c0_i32_0, %arg0 : i32, i32, i32, i32
  }
  func.func @transform_6(%arg0: i32, %arg1: i32) -> (i32, i32, i32, i32) {
    %c0_i32 = arith.constant 0 : i32
    %c0_i32_0 = arith.constant 0 : i32
    %c0_i32_1 = arith.constant 0 : i32
    return %arg1, %c0_i32, %c0_i32_0, %arg0 : i32, i32, i32, i32
  }
  func.func @transform_7(%arg0: i32, %arg1: i32) -> (i32, i32, i32, i32) {
    %c0_i32 = arith.constant 0 : i32
    %c0_i32_0 = arith.constant 0 : i32
    %c0_i32_1 = arith.constant 0 : i32
    return %arg1, %arg0, %c0_i32, %c0_i32_0 : i32, i32, i32, i32
  }
}

</mosaic_0001>

<bundles_post_ra>
// kernel: tpu_custom_call.1
= control target key start
LH: loop header
LB: loop body
LE: loop exit
PB: predicated region body
PF: predicated region fallthrough
CT: control target
= control target key end

     0   :  { %s1981_s0 = inlined_call_operand.vmem [shape: f32[2], index: 0, kind: input, shape index: {}]   ;;  %s1982_s1 = inlined_call_operand.vmem [shape: f32[2,1,8,16], index: 1, kind: input, shape index: {}]   ;;  %s1983_s2 = inlined_call_operand.hbm [shape: f32[2,1,16,32], index: 2, kind: input, shape index: {}]   ;;  %s1984_s3 = inlined_call_operand.vmem [shape: f32[16,8], index: 3, kind: input, shape index: {}]   ;;  %s1985_s4 = inlined_call_operand.vmem [shape: f32[16,32], index: 4, kind: input, shape index: {}]   ;;  %s1986_s5 = inlined_call_operand.hbm [shape: f32[2,1,16,32], index: 5, kind: output, shape index: {0}]   ;;  %s1987_s6 = inlined_call_operand.hbm [shape: f32[2,1,16,32], index: 6, kind: output, shape index: {1}]   ;;  %s1988_s7 = inlined_call_operand.hbm [shape: f32[2,1,1,128], index: 7, kind: output, shape index: {2}]  }
   0x1   :  { %1995 = sst [smem:[#allocation16_spill]] %s1981_s0 }
   0x2   :  { %13 = vsyncpa [#allocation5], 0 }
   0x3   :  { %14 = vsyncpa [#allocation3], 0 }
   0x4   :  { %16 = vsyncpa [#allocation3 + $0x1], 0 }
   0x5   :  { %17 = vsyncpa [#allocation4], 0 }
   0x6   :  { %19 = vsyncpa [#allocation4 + $0x1], 0 }
   0x7   :  { %20 = vsyncpa [#allocation9], 0 }
   0x8   :  { %22 = vsyncpa [#allocation9 + $0x1], 0  ;;  %s1555_s24 = smov 0   ;;  %s1557_s25 = smov 0  }
   0x9   :  { %s1559_s26 = smov 0   ;;  %s1561_s27 = smov 0  }
   0xa   :  { %s1563_s28 = smov 0   ;;  %s1565_s29 = smov 0  }
   0xb LB: > { %1996 = sst [smem:[#allocation15_spill]] %s1503_s29  ;;  %s1586_s30 = sadd.s32 4294967295, %s1503_s29   ;;  %s1503_s29 = sphi %s1565_s29, %s28_s29   ;;  %s1499_s28 = sphi %s1563_s28, %s2023_s28   ;;  %s1495_s27 = sphi %s1561_s27, %s2022_s27   ;;  %s1491_s26 = sphi %s1559_s26, %s2021_s26   ;;  %s1487_s25 = sphi %s1557_s25, %s2020_s25   ;;  %s1483_s24 = sphi %s1555_s24, %s2019_s24  }
   0xc   : > { %s1990_s8 = sadd.s32 4294967294, %s1503_s29   ;;  %p103_p0 = scmp.ne.s32.totalorder %s1491_s26, %s1487_s25 }
   0xd   : > { %p104_p1 = scmp.eq.s32.totalorder %s1503_s29, 0  ;;  %p109_p2 = scmp.ne.s32.totalorder %s1487_s25, %s1483_s24 }
   0xe   : > { %p1993_p3 = scmp.eq.s32.totalorder %s1586_s30, 0  ;;  %p182_p4 = scmp.eq.s32.totalorder %s1586_s30, 1 }
   0xf   : > { %p1597_p5 = por %p104_p1, %p103_p0  ;;  %p188_p6 = scmp.eq.s32.totalorder %s1990_s8, 1 }
  0x10   : > { %p1605_p7 = por %p1993_p3, %p109_p2  ;;  %p1609_p8 = por %p182_p4, %p103_p0 }
  0x11   : > { %p1613_p9 = por %p188_p6, %p109_p2  ;;  %p1113_p10 = scmp.ge.s32.totalorder %s1503_s29, 1 }
  0x12   : > { %s1998_s11 = scalar_select %p1605_p7, 1, 0 }
  0x13   : > { %s1999_s12 = scalar_select %p1609_p8, 1, 0 }
  0x14   : > { %s2000_s13 = scalar_select %p1613_p9, 1, 0 }
  0x15   : > { %p251_p11 = scmp.lt.s32.totalorder %s1503_s29, 3  ;;  %s2001_s0 = sld [smem:[#allocation16_spill]] }
  0x16   : > { %p1239_p0 = scmp.lt.s32.totalorder %s1503_s29, 2  ;;  %s37_s20 = sadd.s32 1, %s1499_s28 }
  0x17   : > { %p1622_p12 = pnand %p1113_p10, %p251_p11  ;;  %p1643_p6 = scmp.ge.s32.totalorder %s37_s20, 2 }
  0x18   : > { %p1632_p2 = pnand %p1239_p0, %p1597_p5  ;;  %s292_s22 = sand.u32 1, %s1491_s26  }
  0x19   : > { %p1220_p1 = pneg %p1622_p12 }
  0x1b   : > { %s264_s16 = sshll.u32 %s2001_s0, 4  ;;  %p1638_p4 = pnand %p1220_p1, %p1993_p3  ;;  %s265_s16 = int_to_ptr.vmem [resolvable:$true] %s264_s16 }
  0x1c   : > { %s1312_s23 = scalar_lea.vmem %s265_s16, 16  ;;  %p1320_p13 = scmp.lt.s32.totalorder %s265_s16, %s265_s16 }
  0x1d   : > { %p1313_p10 = scmp.ne.s32.totalorder %s265_s16, %s1312_s23  ;;  %p1314_p11 = pneg %p1638_p4 }
  0x1e   : > { %p1321_p9 = scmp.lt.s32.totalorder %s1312_s23, %s1312_s23 }
  0x1f   : > { %p1315_p5 = pnand %p1314_p11, %p1313_p10 }
  0x20   : > { %p1322_p8 = por %p1321_p9, %p1320_p13 }
  0x21   : > { %p1316_p0 = pneg %p1315_p5 }
  0x23   : > { %p1323_p1 = pnand %p1322_p8, %p1316_p0 }
  0x25   : > { %1326 = shalt.err (!%p1323_p1)
}
  0x26   : > { %s1505_s10 = smov [#allocation2]   ;;  %s2025_s20 = smov (%p1643_p6, %s37_s20), 0 }
  0x27   : > { %1223 = dma.vmem_to_smem (!%p1638_p4), %s265_s16, 16, %s1505_s10, [#allocation5]  }
  0x28   : > { %s1117_s14 = sshll.u32 %s292_s22, 4  ;;  %s91_s15 = ssub.s32 %s1499_s28, %s2025_s20 }
  0x29   : > { %p94_p9 = scmp.eq.s32.totalorder %s91_s15, 0  ;;  %s1150_s23 = sshll.u32 %s1499_s28, 8 }
  0x2a   : > { %s1662_s19 = scalar_lea.hbm %s1983_s2, %s1150_s23  ;;  %s296_s0 = scalar_lea.vmem [#allocation6], %s1117_s14 }
  0x2b   : > { %s304_s29 = sshll.u32 %s296_s0, 4  ;;  %s2006_s16 = sadd.s32 1, %s1491_s26  ;;  %s1669_s29 = int_to_ptr.vmem [resolvable:$true] %s304_s29 }
  0x2c   : > { %s1667_s21 = scalar_select %p94_p9, %s1491_s26, %s2006_s16  }
  0x2d   : > { %s1671_s10 = scalar_lea.sflag [#allocation3], %s292_s22  ;;  %s1327_s15 = scalar_lea.hbm %s1662_s19, 256 }
  0x2e   : > { %p1328_p8 = scmp.ne.s32.totalorder %s1662_s19, %s1327_s15  ;;  %p1329_p13 = pneg %p1632_p2 }
  0x2f   : > { %s1332_s14 = scalar_lea.hbm %s1983_s2, 512  ;;  %p1333_p10 = scmp.lt.u32.totalorder %s1662_s19, %s1983_s2 }
  0x30   : > { %p1330_p4 = pnand %p1329_p13, %p1328_p8  ;;  %p1334_p11 = scmp.lt.u32.totalorder %s1332_s14, %s1327_s15 }
  0x31   : > { %p1336_p0 = scmp.lt.u32.totalorder %s1327_s15, %s1662_s19 }
  0x32   : > { %p1331_p6 = pneg %p1330_p4  ;;  %p1335_p5 = por %p1334_p11, %p1333_p10 }
  0x34   : > { %p1337_p1 = por %p1336_p0, %p1335_p5 }
  0x36   : > { %p1338_p9 = pnand %p1337_p1, %p1331_p6 }
  0x38   : > { %1341 = shalt.err (!%p1338_p9)
}
  0x39   : > { %s1342_s22 = scalar_lea.vmem %s1669_s29, 256  ;;  %s1506_s16 = smov [#allocation6]  }
  0x3a   : > { %p1343_p8 = scmp.ne.s32.totalorder %s1669_s29, %s1342_s22  ;;  %s1347_s8 = sshll.u32 %s1506_s16, 4  ;;  %s1348_s8 = int_to_ptr.vmem [resolvable:$false] %s1347_s8 }
  0x3b   : > { %s1349_s9 = scalar_lea.vmem %s1348_s8, 512  ;;  %p1350_p7 = scmp.lt.s32.totalorder %s1669_s29, %s1348_s8 }
  0x3c   : > { %p1345_p4 = pnand %p1343_p8, %p1329_p13  ;;  %p1351_p10 = scmp.lt.s32.totalorder %s1349_s9, %s1342_s22 }
  0x3e   : > { %p1346_p3 = pneg %p1345_p4  ;;  %p1352_p11 = por %p1351_p10, %p1350_p7 }
  0x40   : > { %p1353_p5 = pnand %p1352_p11, %p1346_p3 }
  0x42   : > { %1356 = shalt.err (!%p1353_p5)
}
  0x43   : > { %s1507_s15 = smov 128   ;;  %s1508_s14 = smov 8  }
  0x44   : > { %1227 = dma.hbm_to_vmem [thread:$0]  (!%p1632_p2), %s1662_s19, 256, %s1669_s29, %s1671_s10, %s1507_s15, %s1507_s15, %s1508_s14  }
  0x45   : > { %316 = sbr.rel (%p1622_p12) target bundleno = 818 (0x332), region = 40  ;;  %p2007_p13 = scmp.eq.s32.totalorder (!%p1622_p12), %s1586_s30, 0 }
  0x4c   : > { %1466 = dma.done.wait (%p2007_p13), [#allocation5], 16   ;;  %p2008_p6 = pmov %p2007_p13 }
  0x4d   : > { %s1706_s0 = sand.u32 1, %s1487_s25   ;;  %p2009_p3 = scmp.ne.s32.totalorder %s1998_s11, 0 }
  0x4e   : > { %1468 = vsyncadd (%p2008_p6), [#allocation5], 4294967280  ;;  %s1709_s23 = sshll.u32 %s1706_s0, 4  ;;  %s323_s18 = scalar_lea.sflag [#allocation3], %s1706_s0 }
  0x4f   : > { %s326_s29 = scalar_lea.vmem [#allocation6], %s1709_s23 }
  0x50   : > { %1470 = dma.done.wait (%p2009_p3), %s323_s18, 256  }
  0x51   : > { %1472 = vsyncadd (%p2009_p3), %s323_s18, 4294967040 }
  0x52   : > { %331 = sfence }
  0x53   : > { %p375_p7 = scmp.lt.s32.totalorder %s1495_s27, 1  ;;  %v384_v0 = vld [vmem:[%s1984_s3] sm:$0xff]  ;;  %vm386_vm0 = vcmask 64512   ;;  %v469_v2 = vld [vmem:[%s1985_s4 + $0x8] sm:$0xff]  ;;  %vm470_vm1 = vcmask 130048   ;;  %vm552_vm7 = vcmask 261120  }
  0x54   : > { %v468_v1 = vld [vmem:[%s1985_s4] sm:$0xff]  ;;  %1162 = vmatprep.mubr.msk.f32.mxu0 %vm386_vm0, %v384_v0  ;;  %v385_v5 = vld [vmem:[%s1984_s3 + $0x8] sm:$0xff]  ;;  %v1509_v11 = vmov 0.0   ;;  %s555_s10 = sld [smem:[#allocation2 + %s1495_s27]]  ;;  %s1765_s16 = scalar_lea.vmem [#allocation8], %s1709_s23 }
  0x55   : > { %s376_s11 = scalar_select %p375_p7, %s1495_s27, 1  ;;  %v1172_v3 = vpack.c.bf16 %v469_v2, %v468_v1  ;;  %v560_v8 = vld [vmem:[%s326_s29] sm:$0xff]  ;;  %v1135_v9 = vld [vmem:[%s326_s29 + $0x8] sm:$0xff] }
  0x56   : > { %vm570_vm2 = vcmp.gt.f32.partialorder %v560_v8, 0.001  ;;  %vm571_vm3 = vcmp.lt.f32.partialorder %v560_v8, 80.0  ;;  %vm731_vm4 = vcmp.gt.f32.partialorder %v1135_v9, 0.001  ;;  %vm732_vm5 = vcmp.lt.f32.partialorder %v1135_v9, 80.0 }
  0x57   : > { %s1125_s9 = sshll.u32 %s376_s11, 3  ;;  %1173 = vmatprep.subr.bf16.mxu1 %v1172_v3  ;;  %vm1734_vm6 = vmand %vm570_vm2, %vm571_vm3  ;;  %s1751_s29 = scalar_lea.vmem [#allocation7], %s1709_s23 }
  0x58   : > { %s378_s18 = scalar_lea.vmem %s1982_s1, %s1125_s9  ;;  %1175 = vmatpush3.bf16.msra.mxu1 %v1172_v3  ;;  %v1130_v12 = vsel %vm1734_vm6, 1.0, %v1509_v11  ;;  %vm1741_vm8 = vmand %vm731_vm4, %vm732_vm5  ;;  %v573_v27 = vsel %vm1734_vm6, %v560_v8, 1.0  ;;  %s877_s23 = sand.u32 1, %s1586_s30  }
  0x59   : > { %v383_v4 = vld [vmem:[%s378_s18] sm:$0xff]  ;;  %v584_v14 = vsel %vm552_vm7, %v1130_v12, 0.0  ;;  %v1137_v15 = vsel %vm1741_vm8, 1.0, %v1509_v11  ;;  %v734_v25 = vsel %vm1741_vm8, %v1135_v9, 1.0  ;;  %s1151_s8 = sshll.u32 %s1495_s27, 8  ;;  %s913_s14 = sshll.u32 %s1765_s16, 4  ;;  %s1827_s14 = int_to_ptr.vmem [resolvable:$true] %s913_s14 }
  0x5a   : > { %1160 = vmatprep.subr.mxu0 %v383_v4  ;;  %585 = vadd.xlane.f32.xlu0 %v584_v14  ;;  %v745_v16 = vsel %vm552_vm7, %v1137_v15, 0.0  ;;  %s556_s22 = smul.f32 0.54, %s555_s10  ;;  %s1824_s15 = scalar_lea.hbm %s1987_s6, %s1151_s8 }
  0x5b   : > { %1161 = vmatpush3.msra.mxu0 %v383_v4  ;;  %s1832_s19 = scalar_lea.hbm %s1986_s5, %s1151_s8  ;;  %s1834_s10 = scalar_lea.sflag [#allocation9], %s877_s23 }
  0x5c   : > { %1163 = vmatmul.mubr.msk.f32.vlgmr.msra.gmra.mrb[0].mxu0 %vm386_vm0, %v385_v5  ;;  %v565_v26 = vstv %s556_s22  ;;  %s1357_s30 = scalar_lea.vmem %s1827_s14, 256  ;;  %p2014_p2 = scmp.ne.s32.totalorder %s1999_s12, 0 }
  0x5d   : > { %p1358_p12 = scmp.ne.s32.totalorder %s1827_s14, %s1357_s30  ;;  %s1510_s22 = smov [#allocation8]  }
  0x5e   : > { %746 = vadd.xlane.f32.xlu0 %v745_v16  ;;  %s1361_s11 = sshll.u32 %s1510_s22, 4  ;;  %s1362_s11 = int_to_ptr.vmem [resolvable:$false] %s1361_s11 }
  0x5f   : > { %p1359_p0 = pnand %p1358_p12, %p2014_p2  ;;  %p1364_p9 = scmp.lt.s32.totalorder %s1827_s14, %s1362_s11 }
  0x61   : > { %p1360_p1 = pneg %p1359_p0 }
 0x12f   : > { %v1164_v6 = vpop.f32.mrb[0].mxu0 }
 0x130   : > { %v459_v7 = vpop.f32.mrb[1].mxu0 }
 0x131   : > { %1169 = vmatprep.mubr.msk.f32.mxu1 %vm470_vm1, %v459_v7  ;;  %v586_v7 = vpop.xlane.xlu0 %585 }
 0x132   : > { %1170 = vmatmul.mubr.msk.f32.vlgmr.msra.gmra.mrb[0].mxu1 %vm470_vm1, %v1164_v6  ;;  %v587_v8 = vrot.slane %v586_v7, 4 }
 0x205   : > { %v1171_v17 = vpop.f32.mrb[0].mxu1 }
 0x206   : > { %554 = vst.msk [vmem:[%s1751_s29 + $0x8] sm:$0xff] %vm552_vm7, %v1171_v17  ;;  %v543_v18 = vpop.f32.mrb[1].mxu1 }
 0x207   : > { %553 = vst.msk [vmem:[%s1751_s29] sm:$0xff] %vm552_vm7, %v543_v18  ;;  %v588_v18 = vadd.f32 %v587_v8, %v586_v7 }
 0x20d   : > { %v1134_v19 = vld [vmem:[%s1751_s29 + $0x8] sm:$0xff] }
 0x20e   : > { %vm722_vm9 = vcmp.gt.f32.partialorder %v1134_v19, 0.0  ;;  %v723_v20 = vadd.f32 1.0, %v1134_v19  ;;  %v559_v21 = vld [vmem:[%s1751_s29] sm:$0xff] }
 0x20f   : > { %vm561_vm10 = vcmp.gt.f32.partialorder %v559_v21, 0.0  ;;  %v562_v22 = vadd.f32 1.0, %v559_v21 }
 0x210   : > { %v724_v23 = vsel %vm722_vm9, %v1134_v19, %v723_v20 }
 0x211   : > { %1296 = vrcp.f32 %v724_v23  ;;  %v563_v24 = vsel %vm561_vm10, %v559_v21, %v562_v22 }
 0x212   : > { %1298 = vrcp.f32 %v563_v24 }
 0x213   : > { %1300 = vrcp.f32 %v734_v25 }
 0x214   : > { %1302 = vrcp.f32 %v573_v27 }
 0x21b   : > { %v1297_v28 = vpop.eup %1296 }
 0x21c   : > { %v1299_v29 = vpop.eup %1298  ;;  %v726_v30 = vmul.f32 %v1297_v28, %v565_v26 }
 0x21d   : > { %v566_v31 = vmul.f32 %v1299_v29, %v565_v26  ;;  %v1301_v39 = vpop.eup %1300  ;;  %v589_v26 = vrot.slane %v588_v18, 2 }
 0x21e   : > { %v727_v32 = vmax.f32 %v726_v30, 0.001  ;;  %v1303_v42 = vpop.eup %1302 }
 0x21f   : > { %v567_v33 = vmax.f32 %v566_v31, 0.001  ;;  %v590_v10 = vadd.f32 %v589_v26, %v588_v18 }
 0x220   : > { %v728_v34 = vmin.f32 %v727_v32, 80.0 }
 0x221   : > { %v568_v35 = vmin.f32 %v567_v33, 80.0 }
 0x222   : > { %v737_v36 = vsub.f32 %v734_v25, %v728_v34  ;;  %1304 = vrcp.f32 %v728_v34  ;;  %1136 = vst.msk [vmem:[%s1765_s16 + $0x8] sm:$0xff] %vm552_vm7, %v728_v34  ;;  %v739_v60 = vmul.f32 %v1301_v39, %v728_v34 }
 0x223   : > { %v576_v37 = vsub.f32 %v573_v27, %v568_v35  ;;  %1306 = vrcp.f32 %v568_v35  ;;  %569 = vst.msk [vmem:[%s1765_s16] sm:$0xff] %vm552_vm7, %v568_v35  ;;  %v578_v57 = vmul.f32 %v1303_v42, %v568_v35  ;;  %v591_v35 = vrot.slane %v590_v10, 1  ;;  %s1363_s16 = scalar_lea.vmem %s1362_s11, 512 }
 0x224   : > { %v755_v38 = vand.u32 2147483647, %v737_v36  ;;  %v768_v6 = vmul.f32 %v737_v36, %v737_v36  ;;  %p1365_p8 = scmp.lt.s32.totalorder %s1363_s16, %s1357_s30 }
 0x225   : > { %v607_v40 = vmul.f32 %v576_v37, %v576_v37  ;;  %v594_v41 = vand.u32 2147483647, %v576_v37  ;;  %v592_v37 = vadd.f32 %v591_v35, %v590_v10 }
 0x226   : > { %v756_v43 = vmul.f32 %v1301_v39, %v755_v38  ;;  %v781_v15 = vsel %vm1741_vm8, %v768_v6, 0.0  ;;  %v769_v21 = vmul.f32 %v1301_v39, %v768_v6  ;;  %p1366_p4 = por %p1365_p8, %p1364_p9 }
 0x227   : > { %v620_v44 = vsel %vm1734_vm6, %v607_v40, 0.0  ;;  %v595_v45 = vmul.f32 %v1303_v42, %v594_v41  ;;  %v608_v49 = vmul.f32 %v1303_v42, %v607_v40  ;;  %v782_v19 = vsel %vm552_vm7, %v781_v15, 0.0  ;;  %1176 = vpush %v592_v37 }
 0x228   : > { %v621_v46 = vsel %vm552_vm7, %v620_v44, 0.0  ;;  %v757_v48 = vsel %vm1741_vm8, %v756_v43, 0.0  ;;  %v770_v29 = vsel %vm1741_vm8, %v769_v21, 0.0  ;;  %p1367_p10 = pnand %p1366_p4, %p1360_p1 }
 0x229   : > { %622 = vadd.xlane.f32.xlu1 %v621_v46  ;;  %v596_v47 = vsel %vm1734_vm6, %v595_v45, 0.0  ;;  %v758_v52 = vsel %vm552_vm7, %v757_v48, 0.0  ;;  %v609_v54 = vsel %vm1734_vm6, %v608_v49, 0.0  ;;  %v771_v32 = vsel %vm552_vm7, %v770_v29, 0.0 }
 0x22a   : > { %v597_v50 = vsel %vm552_vm7, %v596_v47, 0.0  ;;  %v610_v58 = vsel %vm552_vm7, %v609_v54, 0.0 }
 0x22b   : > { %598 = vadd.xlane.f32.xlu0 %v597_v50 }
 0x22c   : > { %v1305_v51 = vpop.eup %1304 }
 0x22d   : > { %v1307_v53 = vpop.eup %1306  ;;  %759 = vadd.xlane.f32.xlu1 %v758_v52  ;;  %v738_v55 = vmul.f32 %v1305_v51, %v734_v25 }
 0x22e   : > { %v577_v56 = vmul.f32 %v1307_v53, %v573_v27 }
 0x22f   : > { %1308 = vlog2.f32 %v738_v55  ;;  %v740_v2 = vmax.f32 %v738_v55, %v739_v60 }
 0x230   : > { %v579_v59 = vmax.f32 %v577_v56, %v578_v57  ;;  %1310 = vlog2.f32 %v577_v56 }
 0x231   : > { %611 = vadd.xlane.f32.xlu1 %v610_v58  ;;  %vm804_vm14 = vcmp.lt.f32.partialorder %v740_v2, 1.25  ;;  %vm832_vm15 = vcmp.lt.f32.partialorder %v740_v2, 1.953125  ;;  %vm818_vm0 = vcmp.lt.f32.partialorder %v740_v2, 1.5625 }
 0x232   : > { %vm657_vm11 = vcmp.lt.f32.partialorder %v579_v59, 1.5625  ;;  %vm643_vm12 = vcmp.lt.f32.partialorder %v579_v59, 1.25  ;;  %vm671_vm13 = vcmp.lt.f32.partialorder %v579_v59, 1.953125  ;;  %v1138_v17 = vsel %vm804_vm14, 1.0, %v1509_v11 }
 0x233   : > { %v1132_v61 = vsel %vm657_vm11, 1.0, %v1509_v11  ;;  %v1131_v62 = vsel %vm643_vm12, 1.0, %v1509_v11  ;;  %v1133_v63 = vsel %vm671_vm13, 1.0, %v1509_v11  ;;  %v807_v23 = vsel %vm1741_vm8, %v1138_v17, 0.0 }
 0x234   : > { %v660_v0 = vsel %vm1734_vm6, %v1132_v61, 0.0  ;;  %v646_v1 = vsel %vm1734_vm6, %v1131_v62, 0.0  ;;  %v674_v5 = vsel %vm1734_vm6, %v1133_v63, 0.0  ;;  %v1140_v25 = vsel %vm832_vm15, 1.0, %v1509_v11 }
 0x235   : > { %v661_v3 = vsel %vm552_vm7, %v660_v0, 0.0  ;;  %v647_v4 = vsel %vm552_vm7, %v646_v1, 0.0  ;;  %v675_v12 = vsel %vm552_vm7, %v674_v5, 0.0  ;;  %v808_v28 = vsel %vm552_vm7, %v807_v23, 0.0 }
 0x236   : > { %662 = vadd.xlane.f32.xlu0 %v661_v3  ;;  %648 = vadd.xlane.f32.xlu1 %v647_v4  ;;  %v835_v31 = vsel %vm1741_vm8, %v1140_v25, 0.0  ;;  %v1139_v36 = vsel %vm818_vm0, 1.0, %v1509_v11 }
 0x237   : > { %v836_v33 = vsel %vm552_vm7, %v835_v31, 0.0  ;;  %v821_v39 = vsel %vm1741_vm8, %v1139_v36, 0.0 }
 0x238   : > { %v822_v40 = vsel %vm552_vm7, %v821_v39, 0.0 }
 0x239   : > { %v1309_v9 = vpop.eup %1308 }
 0x23a   : > { %v1311_v14 = vpop.eup %1310  ;;  %676 = vadd.xlane.f32.xlu1 %v675_v12  ;;  %v742_v22 = vmul.f32 0.6931472, %v1309_v9 }
 0x23b   : > { %v581_v16 = vmul.f32 0.6931472, %v1311_v14 }
 0x23c   : > { %v792_v30 = vmul.f32 %v742_v22, %v742_v22 }
 0x23d   : > { %v631_v20 = vmul.f32 %v581_v16, %v581_v16 }
 0x23e   : > { %783 = vadd.xlane.f32.xlu1 %v782_v19  ;;  %v793_v34 = vsel %vm1741_vm8, %v792_v30, 0.0 }
 0x23f   : > { %v632_v24 = vsel %vm1734_vm6, %v631_v20, 0.0  ;;  %v794_v38 = vsel %vm552_vm7, %v793_v34, 0.0 }
 0x240   : > { %v633_v27 = vsel %vm552_vm7, %v632_v24, 0.0 }
 0x241   : > { %634 = vadd.xlane.f32.xlu0 %v633_v27 }
 0x242   : > { %809 = vadd.xlane.f32.xlu1 %v808_v28 }
 0x245   : > { %772 = vadd.xlane.f32.xlu0 %v771_v32 }
 0x246   : > { %837 = vadd.xlane.f32.xlu1 %v836_v33 }
 0x249   : > { %795 = vadd.xlane.f32.xlu0 %v794_v38 }
 0x24d   : > { %823 = vadd.xlane.f32.xlu0 %v822_v40 }
 0x24e   : > { %1370 = shalt.err (!%p1367_p10)
}
 0x24f   : > { %s1371_s23 = scalar_lea.hbm %s1824_s15, 256  ;;  %s1375_s18 = scalar_lea.hbm %s1987_s6, 512 }
 0x250   : > { %p1372_p11 = scmp.ne.s32.totalorder %s1824_s15, %s1371_s23  ;;  %p1376_p6 = scmp.lt.u32.totalorder %s1824_s15, %s1987_s6 }
 0x251   : > { %p1377_p3 = scmp.lt.u32.totalorder %s1375_s18, %s1371_s23  ;;  %p1379_p12 = scmp.lt.u32.totalorder %s1371_s23, %s1824_s15 }
 0x252   : > { %p1373_p5 = pnand %p1372_p11, %p2014_p2 }
 0x253   : > { %p1378_p7 = por %p1377_p3, %p1376_p6 }
 0x254   : > { %p1374_p13 = pneg %p1373_p5 }
 0x255   : > { %p1380_p0 = por %p1379_p12, %p1378_p7 }
 0x257   : > { %p1381_p1 = pnand %p1380_p0, %p1374_p13 }
 0x259   : > { %1384 = shalt.err (!%p1381_p1)
}
 0x25a   : > { %s1511_s30 = smov 128   ;;  %s1512_s11 = smov 8  }
 0x25b   : > { %1215 = dma.vmem_to_hbm [thread:$0]  (%p2014_p2), %s1827_s14, 256, %s1824_s15, %s1834_s10, %s1511_s30, %s1511_s30, %s1512_s11  }
 0x25c   : > { %s896_s16 = sshll.u32 %s1751_s29, 4  ;;  %s873_s23 = scalar_lea.sflag [#allocation4], %s1706_s0  ;;  %s1862_s16 = int_to_ptr.vmem [resolvable:$true] %s896_s16 }
 0x25d   : > { %s1385_s8 = scalar_lea.vmem %s1862_s16, 256  ;;  %s1513_s9 = smov [#allocation7]  }
 0x25e   : > { %p1386_p9 = scmp.ne.s32.totalorder %s1862_s16, %s1385_s8  ;;  %s1389_s18 = sshll.u32 %s1513_s9, 4  ;;  %s1390_s18 = int_to_ptr.vmem [resolvable:$false] %s1389_s18 }
 0x25f   : > { %s1391_s17 = scalar_lea.vmem %s1390_s18, 512  ;;  %p1392_p10 = scmp.lt.s32.totalorder %s1862_s16, %s1390_s18 }
 0x260   : > { %p1387_p8 = pnand %p1386_p9, %p2014_p2  ;;  %p1393_p11 = scmp.lt.s32.totalorder %s1391_s17, %s1385_s8 }
 0x262   : > { %p1388_p4 = pneg %p1387_p8  ;;  %p1394_p5 = por %p1393_p11, %p1392_p10 }
 0x264   : > { %p1395_p13 = pnand %p1394_p5, %p1388_p4 }
 0x266   : > { %1398 = shalt.err (!%p1395_p13)
}
 0x267   : > { %s1399_s29 = scalar_lea.hbm %s1832_s19, 256  ;;  %s1403_s22 = scalar_lea.hbm %s1986_s5, 512 }
 0x268   : > { %p1400_p6 = scmp.ne.s32.totalorder %s1832_s19, %s1399_s29  ;;  %p1404_p12 = scmp.lt.u32.totalorder %s1832_s19, %s1986_s5 }
 0x269   : > { %p1405_p0 = scmp.lt.u32.totalorder %s1403_s22, %s1399_s29  ;;  %p1407_p9 = scmp.lt.u32.totalorder %s1399_s29, %s1832_s19 }
 0x26a   : > { %p1401_p3 = pnand %p1400_p6, %p2014_p2 }
 0x26b   : > { %p1406_p1 = por %p1405_p0, %p1404_p12 }
 0x26c   : > { %p1402_p7 = pneg %p1401_p3 }
 0x26d   : > { %p1408_p8 = por %p1407_p9, %p1406_p1 }
 0x26f   : > { %p1409_p4 = pnand %p1408_p8, %p1402_p7 }
 0x271   : > { %1412 = shalt.err (!%p1409_p4)
}
 0x272   : > { %1214 = dma.vmem_to_hbm [thread:$0]  (%p2014_p2), %s1862_s16, 256, %s1832_s19, %s873_s23, %s1511_s30, %s1511_s30, %s1512_s11   ;;  %v747_v11 = vpop.xlane.xlu0 %746 }
 0x273   : > { %v748_v2 = vrot.slane %v747_v11, 4  ;;  %s1177_s19 = spop %1176 }
 0x275   : > { %v749_v14 = vadd.f32 %v748_v2, %v747_v11 }
 0x277   : > { %v750_v24 = vrot.slane %v749_v14, 2 }
 0x279   : > { %v751_v38 = vadd.f32 %v750_v24, %v749_v14 }
 0x2b6   : > { %v623_v13 = vpop.xlane.xlu1 %622 }
 0x2b7   : > { %v624_v41 = vrot.slane %v623_v13, 4 }
 0x2b8   : > { %v599_v42 = vpop.xlane.xlu0 %598 }
 0x2b9   : > { %v600_v43 = vrot.slane %v599_v42, 4  ;;  %v625_v44 = vadd.f32 %v624_v41, %v623_v13 }
 0x2ba   : > { %v760_v45 = vpop.xlane.xlu1 %759 }
 0x2bb   : > { %v601_v46 = vadd.f32 %v600_v43, %v599_v42  ;;  %v626_v48 = vrot.slane %v625_v44, 2  ;;  %v761_v4 = vrot.slane %v760_v45, 4 }
 0x2bd   : > { %v602_v47 = vrot.slane %v601_v46, 2  ;;  %v627_v54 = vadd.f32 %v626_v48, %v625_v44  ;;  %v762_v15 = vadd.f32 %v761_v4, %v760_v45 }
 0x2be   : > { %v612_v49 = vpop.xlane.xlu1 %611 }
 0x2bf   : > { %v613_v50 = vrot.slane %v612_v49, 4  ;;  %v603_v51 = vadd.f32 %v602_v47, %v601_v46  ;;  %v628_v61 = vrot.slane %v627_v54, 1  ;;  %v763_v26 = vrot.slane %v762_v15, 2 }
 0x2c1   : > { %v614_v52 = vadd.f32 %v613_v50, %v612_v49  ;;  %v604_v53 = vrot.slane %v603_v51, 1  ;;  %v629_v6 = vadd.f32 %v628_v61, %v627_v54  ;;  %v764_v41 = vadd.f32 %v763_v26, %v762_v15 }
 0x2c2   : > { %v752_v50 = vrot.slane %v751_v38, 1 }
 0x2c3   : > { %v615_v55 = vrot.slane %v614_v52, 2  ;;  %v649_v56 = vpop.xlane.xlu1 %648  ;;  %v605_v57 = vadd.f32 %v604_v53, %v603_v51  ;;  %v663_v58 = vpop.xlane.xlu0 %662 }
 0x2c4   : > { %v650_v60 = vrot.slane %v649_v56, 4  ;;  %v664_v62 = vrot.slane %v663_v58, 4 }
 0x2c5   : > { %1178 = vpush %v605_v57  ;;  %v616_v59 = vadd.f32 %v615_v55, %v614_v52  ;;  %v765_v55 = vrot.slane %v764_v41, 1 }
 0x2c6   : > { %v651_v5 = vadd.f32 %v650_v60, %v649_v56  ;;  %v665_v7 = vadd.f32 %v664_v62, %v663_v58 }
 0x2c7   : > { %v677_v63 = vpop.xlane.xlu1 %676  ;;  %v617_v0 = vrot.slane %v616_v59, 1  ;;  %v766_v4 = vadd.f32 %v765_v55, %v764_v41 }
 0x2c8   : > { %v678_v1 = vrot.slane %v677_v63, 4  ;;  %v652_v16 = vrot.slane %v651_v5, 2  ;;  %v666_v18 = vrot.slane %v665_v7, 2 }
 0x2c9   : > { %v618_v3 = vadd.f32 %v617_v0, %v616_v59  ;;  %v753_v0 = vadd.f32 %v752_v50, %v751_v38 }
 0x2ca   : > { %v679_v9 = vadd.f32 %v678_v1, %v677_v63  ;;  %v653_v29 = vadd.f32 %v652_v16, %v651_v5  ;;  %v667_v32 = vadd.f32 %v666_v18, %v665_v7 }
 0x2cb   : > { %1180 = vpush %v618_v3  ;;  %v784_v8 = vpop.xlane.xlu1 %783 }
 0x2cc   : > { %1182 = vpush %v629_v6  ;;  %v785_v12 = vrot.slane %v784_v8, 4  ;;  %v680_v21 = vrot.slane %v679_v9, 2  ;;  %v654_v13 = vrot.slane %v653_v29, 1  ;;  %v668_v45 = vrot.slane %v667_v32, 1 }
 0x2ce   : > { %v635_v17 = vpop.xlane.xlu0 %634  ;;  %v786_v22 = vadd.f32 %v785_v12, %v784_v8  ;;  %v681_v35 = vadd.f32 %v680_v21, %v679_v9  ;;  %v655_v54 = vadd.f32 %v654_v13, %v653_v29  ;;  %v669_v59 = vadd.f32 %v668_v45, %v667_v32 }
 0x2cf   : > { %v636_v19 = vrot.slane %v635_v17, 4  ;;  %v810_v20 = vpop.xlane.xlu1 %809  ;;  %v686_v21 = vstv %s1177_s19 }
 0x2d0   : > { %v811_v23 = vrot.slane %v810_v20, 4  ;;  %v787_v33 = vrot.slane %v786_v22, 2  ;;  %v682_v46 = vrot.slane %v681_v35, 1 }
 0x2d1   : > { %v637_v25 = vadd.f32 %v636_v19, %v635_v17  ;;  %v557_v19 = vlaneseq }
 0x2d2   : > { %v812_v27 = vadd.f32 %v811_v23, %v810_v20  ;;  %v773_v28 = vpop.xlane.xlu0 %772  ;;  %v788_v47 = vadd.f32 %v787_v33, %v786_v22  ;;  %v683_v61 = vadd.f32 %v682_v46, %v681_v35 }
 0x2d3   : > { %v638_v30 = vrot.slane %v637_v25, 2  ;;  %v774_v31 = vrot.slane %v773_v28, 4  ;;  %v838_v10 = vpop.xlane.xlu1 %837  ;;  %v1891_v20 = vand.u32 127, %v557_v19 }
 0x2d4   : > { %v839_v34 = vrot.slane %v838_v10, 4  ;;  %v813_v39 = vrot.slane %v812_v27, 2  ;;  %v789_v62 = vrot.slane %v788_v47, 1 }
 0x2d5   : > { %v775_v36 = vadd.f32 %v774_v31, %v773_v28  ;;  %v639_v37 = vadd.f32 %v638_v30, %v637_v25  ;;  %vm685_vm1 = vcmp.eq.s32.totalorder %v1891_v20, 0  ;;  %vm689_vm2 = vcmp.eq.s32.totalorder %v1891_v20, 1 }
 0x2d6   : > { %v840_v40 = vadd.f32 %v839_v34, %v838_v10  ;;  %v796_v11 = vpop.xlane.xlu0 %795  ;;  %v814_v56 = vadd.f32 %v813_v39, %v812_v27  ;;  %v790_v8 = vadd.f32 %v789_v62, %v788_v47  ;;  %vm693_vm3 = vcmp.eq.s32.totalorder %v1891_v20, 2 }
 0x2d7   : > { %v776_v42 = vrot.slane %v775_v36, 2  ;;  %v797_v43 = vrot.slane %v796_v11, 4  ;;  %v640_v44 = vrot.slane %v639_v37, 1  ;;  %v687_v24 = vsel %vm685_vm1, %v686_v21, 0.0 }
 0x2d8   : > { %v841_v52 = vrot.slane %v840_v40, 2  ;;  %v815_v5 = vrot.slane %v814_v56, 1  ;;  %vm697_vm4 = vcmp.eq.s32.totalorder %v1891_v20, 3  ;;  %vm701_vm5 = vcmp.eq.s32.totalorder %v1891_v20, 4 }
 0x2d9   : > { %v798_v48 = vadd.f32 %v797_v43, %v796_v11  ;;  %v641_v49 = vadd.f32 %v640_v44, %v639_v37  ;;  %v777_v51 = vadd.f32 %v776_v42, %v775_v36  ;;  %vm705_vm6 = vcmp.eq.s32.totalorder %v1891_v20, 5 }
 0x2da   : > { %v824_v53 = vpop.xlane.xlu0 %823  ;;  %v842_v3 = vadd.f32 %v841_v52, %v840_v40  ;;  %v816_v14 = vadd.f32 %v815_v5, %v814_v56  ;;  %vm709_vm7 = vcmp.eq.s32.totalorder %v1891_v20, 6  ;;  %vm713_vm8 = vcmp.eq.s32.totalorder %v1891_v20, 7 }
 0x2db   : > { %v799_v57 = vrot.slane %v798_v48, 2  ;;  %v825_v58 = vrot.slane %v824_v53, 4  ;;  %1184 = vpush %v641_v49  ;;  %v778_v60 = vrot.slane %v777_v51, 1 }
 0x2dc   : > { %1186 = vpush %v655_v54  ;;  %v843_v15 = vrot.slane %v842_v3, 1 }
 0x2dd   : > { %v826_v63 = vadd.f32 %v825_v58, %v824_v53  ;;  %1188 = vpush %v669_v59  ;;  %v779_v1 = vadd.f32 %v778_v60, %v777_v51  ;;  %v800_v2 = vadd.f32 %v799_v57, %v798_v48 }
 0x2de   : > { %1190 = vpush %v683_v61  ;;  %v844_v18 = vadd.f32 %v843_v15, %v842_v3 }
 0x2df   : > { %v827_v6 = vrot.slane %v826_v63, 2  ;;  %1192 = vpush %v753_v0  ;;  %v801_v7 = vrot.slane %v800_v2, 1 }
 0x2e0   : > { %1194 = vpush %v766_v4 }
 0x2e1   : > { %v828_v9 = vadd.f32 %v827_v6, %v826_v63  ;;  %1196 = vpush %v779_v1  ;;  %v802_v12 = vadd.f32 %v801_v7, %v800_v2 }
 0x2e2   : > { %1198 = vpush %v790_v8 }
 0x2e3   : > { %1200 = vpush %v802_v12  ;;  %v829_v16 = vrot.slane %v828_v9, 1 }
 0x2e4   : > { %1202 = vpush %v816_v14 }
 0x2e5   : > { %v830_v17 = vadd.f32 %v829_v16, %v828_v9 }
 0x2e7   : > { %1204 = vpush %v830_v17 }
 0x2e8   : > { %1206 = vpush %v844_v18 }
 0x2f6   : > { %s1179_s30 = spop %1178 }
 0x2f7   : > { %v690_v22 = vstv %s1179_s30 }
 0x2f8   : > { %v691_v25 = vsel %vm689_vm2, %v690_v22, 0.0 }
 0x2f9   : > { %v692_v27 = vadd.f32 %v691_v25, %v687_v24 }
 0x2fc   : > { %s1181_s11 = spop %1180 }
 0x2fd   : > { %v694_v23 = vstv %s1181_s11  ;;  %s1183_s16 = spop %1182 }
 0x2fe   : > { %v695_v26 = vsel %vm693_vm3, %v694_v23, 0.0  ;;  %v698_v29 = vstv %s1183_s16  ;;  %s1147_s16 = sshll.u32 %s1495_s27, 4 }
 0x2ff   : > { %v696_v28 = vadd.f32 %v695_v26, %v692_v27  ;;  %v699_v31 = vsel %vm697_vm4, %v698_v29, 0.0 }
 0x301   : > { %v700_v33 = vadd.f32 %v699_v31, %v696_v28 }
 0x30c   : > { %s1185_s23 = spop %1184 }
 0x30d   : > { %s1187_s8 = spop %1186  ;;  %v702_v30 = vstv %s1185_s23  ;;  %s374_s23 = scalar_lea.vmem [#allocation10], %s1706_s0 }
 0x30e   : > { %s1904_s17 = spop %1188  ;;  %v703_v10 = vsel %vm701_vm5, %v702_v30, 0.0  ;;  %v706_v36 = vstv %s1187_s8  ;;  %s930_s8 = sshll.u32 %s374_s23, 4  ;;  %s931_s8 = int_to_ptr.vmem [resolvable:$true] %s930_s8 }
 0x30f   : > { %s1906_s29 = spop %1190  ;;  %v704_v39 = vadd.f32 %v703_v10, %v700_v33  ;;  %v707_v43 = vsel %vm705_vm6, %v706_v36, 0.0  ;;  %v710_v47 = vstv %s1904_s17 }
 0x310   : > { %s1193_s15 = spop %1192  ;;  %v711_v52 = vsel %vm709_vm7, %v710_v47, 0.0  ;;  %v714_v56 = vstv %s1906_s29  ;;  %s1413_s29 = scalar_lea.vmem %s931_s8, 16 }
 0x311   : > { %v846_v32 = vstv %s1193_s15  ;;  %s1195_s14 = spop %1194  ;;  %v708_v46 = vadd.f32 %v707_v43, %v704_v39  ;;  %v715_v60 = vsel %vm713_vm8, %v714_v56, 0.0  ;;  %p1414_p10 = scmp.ne.s32.totalorder %s931_s8, %s1413_s29 }
 0x312   : > { %v847_v34 = vsel %vm685_vm1, %v846_v32, 0.0  ;;  %v849_v35 = vstv %s1195_s14  ;;  %s1197_s22 = spop %1196  ;;  %s1936_s14 = scalar_lea.hbm %s1988_s7, %s1147_s16 }
 0x313   : > { %v850_v37 = vsel %vm689_vm2, %v849_v35, 0.0  ;;  %v852_v38 = vstv %s1197_s22  ;;  %s1199_s9 = spop %1198  ;;  %v712_v55 = vadd.f32 %v711_v52, %v708_v46  ;;  %p1415_p11 = pnand %p1414_p10, %p2014_p2 }
 0x314   : > { %v851_v40 = vadd.f32 %v850_v37, %v847_v34  ;;  %v853_v11 = vsel %vm693_vm3, %v852_v38, 0.0  ;;  %v855_v13 = vstv %s1199_s9  ;;  %s1201_s18 = spop %1200  ;;  %s1514_s22 = smov [#allocation10]  }
 0x315   : > { %v858_v41 = vstv %s1201_s18  ;;  %s1203_s19 = spop %1202  ;;  %v856_v44 = vsel %vm697_vm4, %v855_v13, 0.0  ;;  %v716_v62 = vadd.f32 %v715_v60, %v712_v55  ;;  %p1416_p5 = pneg %p1415_p11 }
 0x316   : > { %v854_v42 = vadd.f32 %v853_v11, %v851_v40  ;;  %v859_v45 = vsel %vm701_vm5, %v858_v41, 0.0  ;;  %v861_v49 = vstv %s1203_s19  ;;  %s1417_s9 = sshll.u32 %s1514_s22, 4  ;;  %s1418_s9 = int_to_ptr.vmem [resolvable:$false] %s1417_s9 }
 0x317   : > { %v862_v53 = vsel %vm705_vm6, %v861_v49, 0.0  ;;  %s1419_s27 = scalar_lea.vmem %s1418_s9, 32  ;;  %p1420_p13 = scmp.lt.s32.totalorder %s931_s8, %s1418_s9 }
 0x318   : > { %v857_v48 = vadd.f32 %v856_v44, %v854_v42  ;;  %s1205_s30 = spop %1204  ;;  %p1421_p6 = scmp.lt.s32.totalorder %s1419_s27, %s1413_s29 }
 0x319   : > { %v864_v50 = vstv %s1205_s30  ;;  %s1207_s11 = spop %1206 }
 0x31a   : > { %v860_v51 = vadd.f32 %v859_v45, %v857_v48  ;;  %v865_v54 = vsel %vm709_vm7, %v864_v50, 0.0  ;;  %v867_v58 = vstv %s1207_s11  ;;  %p1422_p3 = por %p1421_p6, %p1420_p13 }
 0x31b   : > { %v868_v61 = vsel %vm713_vm8, %v867_v58, 0.0 }
 0x31c   : > { %v863_v57 = vadd.f32 %v862_v53, %v860_v51  ;;  %p1423_p7 = pnand %p1422_p3, %p1416_p5 }
 0x31e   : > { %v866_v59 = vadd.f32 %v865_v54, %v863_v57 }
 0x320   : > { %v869_v63 = vadd.f32 %v868_v61, %v866_v59 }
 0x322   : > { %v870_v0 = vadd.f32 %v869_v63, %v716_v62 }
 0x324   : > { %871 = vst [vmem:[%s374_s23] sm:$0x1] %v870_v0 }
 0x325   : > { %1426 = shalt.err (!%p1423_p7)
}
 0x326   : > { %s1427_s0 = scalar_lea.hbm %s1936_s14, 16  ;;  %s1431_s30 = scalar_lea.hbm %s1988_s7, 32 }
 0x327   : > { %p1428_p12 = scmp.ne.s32.totalorder %s1936_s14, %s1427_s0  ;;  %p1432_p9 = scmp.lt.u32.totalorder %s1936_s14, %s1988_s7 }
 0x328   : > { %p1433_p8 = scmp.lt.u32.totalorder %s1431_s30, %s1427_s0  ;;  %p1435_p10 = scmp.lt.u32.totalorder %s1427_s0, %s1936_s14 }
 0x329   : > { %p1429_p0 = pnand %p1428_p12, %p2014_p2 }
 0x32a   : > { %p1434_p4 = por %p1433_p8, %p1432_p9 }
 0x32b   : > { %p1430_p1 = pneg %p1429_p0 }
 0x32c   : > { %p1436_p11 = por %p1435_p10, %p1434_p4 }
 0x32e   : > { %p1437_p5 = pnand %p1436_p11, %p1430_p1 }
 0x330   : > { %1440 = shalt.err (!%p1437_p5)
}
 0x331   : > { %1216 = dma.vmem_to_hbm [thread:$0]  (%p2014_p2), %s931_s8, 16, %s1936_s14, %s1834_s10  }
 0x332 PF: > { %s2015_s23 = sld [smem:[#allocation15_spill]]  ;;  %s942_s17 = sand.u32 1, %s1483_s24  }
 0x333   : > { %p2016_p13 = scmp.ne.s32.totalorder %s2000_s13, 0  ;;  %s943_s15 = scalar_lea.sflag [#allocation4], %s942_s17 }
 0x338   : > { %p2017_p6 = scmp.ge.s32.totalorder %s2015_s23, 2 }
 0x33a   : > { %p1229_p3 = pnand %p2017_p6, %p2016_p13 }
 0x33c   : > { %1474 = dma.done.wait (!%p1229_p3), %s943_s15, 256  }
 0x33d   : > { %1476 = vsyncadd (!%p1229_p3), %s943_s15, 4294967040  ;;  %s2018_s29 = sadd.s32 4294967294, %s2015_s23  }
 0x33e   : > { %s951_s22 = sand.u32 1, %s2018_s29  }
 0x33f   : > { %s952_s9 = scalar_lea.sflag [#allocation9], %s951_s22 }
 0x340   : > { %1478 = dma.done.wait (!%p1229_p3), %s952_s9, 272  }
 0x341   : > { %1480 = vsyncadd (!%p1229_p3), %s952_s9, 4294967024  ;;  %s28_s29 = sadd.s32 1, %s2015_s23   ;;  %s2019_s24 = smov %s1487_s25 }
 0x342   : > { %p25_p2 = scmp.ge.s32.totalorder %s28_s29, 4   ;;  %s2020_s25 = smov %s1491_s26 }
 0x343   : > { %s2021_s26 = smov %s1667_s21  ;;  %s2022_s27 = smov %s1499_s28 }
 0x344   : > { %s2023_s28 = smov %s2025_s20  ;;  %27 = sbr.rel (!%p25_p2) target bundleno = 11 (0xb), region = 131 }
 0x34b   :  { %965 = vsyncpa [#allocation3], 1 }
 0x34c   :  { %967 = vsyncpa [#allocation3 + $0x1], 1 }
 0x34d   :  { %968 = vsyncpa [#allocation4], 1 }
 0x34e   :  { %970 = vsyncpa [#allocation4 + $0x1], 1 }
 0x34f   :  { %971 = vsyncpa [#allocation9], 1 }
 0x350   :  { %973 = vsyncpa [#allocation9 + $0x1], 1 }
 0x351   :  { %974 = vsyncpa [#allocation5], 1 }
 0x352   :  { %976 = vsyncpa [#allocation5 + $0x1], 1 }

</bundles_post_ra>
